<compile_context>
chip_gen: v5e
topology: v5e:2x2
jax: 0.10.0
libtpu: 0.0.40
codegen_flags: <defaults>
</compile_context>

<pallas_src>
from functools import partial

import jax
import jax.numpy as jnp
from jax.experimental import pallas as pl
from jax.experimental.pallas import tpu as pltpu


# ---------------------------------------------------------------------------
# VMEM-limit helper
# ---------------------------------------------------------------------------
def _scoped_vmem_cap_bytes():
    phys = 64 * 1024 * 1024
    try:
        info_phys = int(pltpu.get_tpu_info().vmem_capacity_bytes)
        if info_phys > 0:
            phys = info_phys
    except Exception:
        pass
    # Leave headroom for Mosaic internal scratch / semaphores.
    cap = min(phys * 3 // 4, 100 * 1024 * 1024)
    return max(cap, 32 * 1024 * 1024)


def _clamp_vmem_limit(est_bytes):
    return int(min(max(int(est_bytes), 32 * 1024 * 1024), _scoped_vmem_cap_bytes()))


# ---------------------------------------------------------------------------
# 1) Stoichiometric multi-head attention + frac_mlp bias + norm1 (fused)
# ---------------------------------------------------------------------------
def attn_norm1_kernel(x_ref, wq_ref, wk_ref, wv_ref, wo_ref,
                      bq_ref, bk_ref, bv_ref, bo_ref,
                      fcol_ref, frow_ref,
                      ap_ref, an_ref, gamma_ref, delta_ref,
                      fm_w1_ref, fm_b1_ref, fm_w2_ref, fm_b2_ref,
                      g1_ref, b1n_ref,
                      o_ref,
                      q_scr, k_scr, v_scr, oh_scr,
                      *, nhead, head_dim, add_frac_bias, zeps, ln_eps):
    x = x_ref[0]                                   # [T, dm] f32
    T = x.shape[0]
    scale = float(head_dim) ** -0.5
    denom = float(max(T - 1, 1))                   # guard T==1 (unbiased std)

    gamma = gamma_ref[0]
    delta = delta_ref[0]

    # --- full-width QKV projections: bf16 MXU, f32 accumulate ---------------
    xb = x.astype(jnp.bfloat16)
    q_scr[...] = (jnp.dot(xb, wq_ref[...], preferred_element_type=jnp.float32)
                  + bq_ref[...]).astype(jnp.bfloat16)
    k_scr[...] = (jnp.dot(xb, wk_ref[...], preferred_element_type=jnp.float32)
                  + bk_ref[...]).astype(jnp.bfloat16)
    v_scr[...] = (jnp.dot(xb, wv_ref[...], preferred_element_type=jnp.float32)
                  + bv_ref[...]).astype(jnp.bfloat16)

    # --- frac-distance + hoisted per-row statistics (head-independent) ------
    if add_frac_bias:
        fi = fcol_ref[0]                           # [T, 1]
        fj = frow_ref[0]                           # [1, T]
        d = (fj - fi) * pl.reciprocal(fi * fj + 1e-8, approx=True)   # [T, T]
        d_pos = jnp.maximum(d, 0.0)
        d_neg = jnp.minimum(d, 0.0)                # == -relu(-d)
        sp = jnp.sum(d_pos, axis=-1, keepdims=True)
        sn = jnp.sum(d_neg, axis=-1, keepdims=True)
        sp2 = jnp.sum(d_pos * d_pos, axis=-1, keepdims=True)
        sn2 = jnp.sum(d_neg * d_neg, axis=-1, keepdims=True)
        # d_pos * d_neg == 0 elementwise, so no cross term is needed.

    # --- per-head attention (only QK^T / PV are per-head) -------------------
    for h in range(nhead):
        sl = slice(h * head_dim, (h + 1) * head_dim)
        qh = q_scr[:, sl]                          # bf16 [T, hd]
        kh = k_scr[:, sl]
        logits = jax.lax.dot_general(
            qh, kh, (((1,), (1,)), ((), ())),
            preferred_element_type=jnp.float32) * scale                # [T, T]

        mean = jnp.mean(logits, axis=-1, keepdims=True)
        diff = logits - mean
        var = jnp.sum(diff * diff, axis=-1, keepdims=True) * (1.0 / denom)
        w = gamma * (diff * pl.reciprocal(jnp.sqrt(var) + zeps, approx=True))

        if add_frac_bias:
            ap = ap_ref[h]
            an = an_ref[h]
            mean_b = (ap * sp + an * sn) * (1.0 / T)
            var_b = jnp.maximum(ap * ap * sp2 + an * an * sn2
                                - T * mean_b * mean_b, 0.0) * (1.0 / denom)
            inv_b = delta * pl.reciprocal(jnp.sqrt(var_b) + zeps, approx=True)
            w = w + (ap * inv_b) * d_pos + (an * inv_b) * d_neg - mean_b * inv_b

        # TODO(synk): attn_mask / key_padding_mask not supported (assumed None).
        w = w - jnp.max(w, axis=-1, keepdims=True)
        p = jnp.exp(w)
        p = p * pl.reciprocal(jnp.sum(p, axis=-1, keepdims=True), approx=True)

        oh_scr[:, sl] = jnp.dot(p.astype(jnp.bfloat16), v_scr[:, sl],
                                preferred_element_type=jnp.float32)

    # --- concat-heads @ Wo (single lane-dense matmul) ------------------------
    attn = (jnp.dot(oh_scr[...].astype(jnp.bfloat16), wo_ref[...],
                    preferred_element_type=jnp.float32) + bo_ref[...])

    # --- fused epilogue: residual (+ frac_mlp bias) + norm1 ------------------
    resid = x + attn
    if add_frac_bias:
        h1 = jnp.maximum(fcol_ref[0] * fm_w1_ref[...] + fm_b1_ref[...], 0.0)
        resid = resid + (jnp.dot(h1.astype(jnp.bfloat16), fm_w2_ref[...],
                                 preferred_element_type=jnp.float32)
                         + fm_b2_ref[...])
    mu = jnp.mean(resid, axis=-1, keepdims=True)
    cen = resid - mu
    var = jnp.mean(cen * cen, axis=-1, keepdims=True)
    o_ref[0] = (cen * jax.lax.rsqrt(var + ln_eps) * g1_ref[...]
                + b1n_ref[...]).astype(o_ref.dtype)


def stoich_attention_norm1(x, frac, attn_p, frac_mlp_p, norm1_p, *,
                           add_frac_bias, ln_eps=1e-5):
    B, T, dm = x.shape
    H = attn_p["alpha_pos"].shape[0]
    assert dm % H == 0
    hd = dm // H
    bf16 = jnp.bfloat16

    wq = attn_p["wq"].astype(bf16)
    wk = attn_p["wk"].astype(bf16)
    wv = attn_p["wv"].astype(bf16)
    wo = attn_p["wo"].astype(bf16)
    fm_w2 = frac_mlp_p["w2"].astype(bf16)

    fcol = frac[:, :, None].astype(jnp.float32)    # [B, T, 1]
    frow = frac[:, None, :].astype(jnp.float32)    # [B, 1, T]

    def const(shape):
        nd = len(shape)
        return pl.BlockSpec(shape, lambda b, _n=nd: (0,) * _n)

    smem = pl.BlockSpec(memory_space=pltpu.MemorySpace.SMEM)

    est = (4 * T * dm * 4                          # x + x1 tiles (double-buffered)
           + 5 * dm * dm * 2 + 10 * dm * 4         # bf16 weights + f32 vectors
           + 8 * T * 4                             # frac rows/cols
           + 3 * T * dm * 2 + T * dm * 4           # q/k/v (bf16) + head-concat
           + 10 * T * T * 4)                       # [T,T] temporaries headroom
    vmem_limit = _clamp_vmem_limit(2 * est)

    return pl.pallas_call(
        partial(attn_norm1_kernel, nhead=H, head_dim=hd,
                add_frac_bias=add_frac_bias, zeps=1e-5, ln_eps=ln_eps),
        out_shape=jax.ShapeDtypeStruct((B, T, dm), x.dtype),
        grid_spec=pltpu.PrefetchScalarGridSpec(
            num_scalar_prefetch=0,
            grid=(B,),
            in_specs=[
                pl.BlockSpec((1, T, dm), lambda b: (b, 0, 0)),      # x
                const((dm, dm)), const((dm, dm)),                   # Wq, Wk
                const((dm, dm)), const((dm, dm)),                   # Wv, Wo
                const((1, dm)), const((1, dm)),                     # bq, bk
                const((1, dm)), const((1, dm)),                     # bv, bo
                pl.BlockSpec((1, T, 1), lambda b: (b, 0, 0)),       # frac col
                pl.BlockSpec((1, 1, T), lambda b: (b, 0, 0)),       # frac row
                smem, smem, smem, smem,               # alpha+/-, gamma, delta
                const((1, dm)), const((1, dm)),                     # frac_mlp W1,b1
                const((dm, dm)), const((1, dm)),                    # frac_mlp W2,b2
                const((1, dm)), const((1, dm)),                     # norm1 g,b
            ],
            out_specs=pl.BlockSpec((1, T, dm), lambda b: (b, 0, 0)),
            scratch_shapes=[pltpu.VMEM((T, dm), bf16),              # q
                            pltpu.VMEM((T, dm), bf16),              # k
                            pltpu.VMEM((T, dm), bf16),              # v
                            pltpu.VMEM((T, dm), jnp.float32)]),     # head concat
        compiler_params=pltpu.CompilerParams(
            dimension_semantics=("parallel",),
            vmem_limit_bytes=vmem_limit),
    )(x, wq, wk, wv, wo,
      attn_p["bq"], attn_p["bk"], attn_p["bv"], attn_p["bo"],
      fcol, frow,
      attn_p["alpha_pos"], attn_p["alpha_neg"], attn_p["gamma"], attn_p["delta"],
      frac_mlp_p["w1"], frac_mlp_p["b1"], fm_w2, frac_mlp_p["b2"],
      norm1_p["gamma"], norm1_p["beta"])


# ---------------------------------------------------------------------------
# 2) Top-2 MoE feed-forward + norm2 (fused)
# ---------------------------------------------------------------------------
def moe_norm2_kernel(flags_ref, widx_ref, x_ref, c_ref, w1_ref, b1_ref,
                     w2_ref, b2_ref, g2_ref, b2n_ref, o_ref, acc_ref,
                     *, ln_eps):
    i = pl.program_id(0)                 # token-tile index ("parallel")
    e = pl.program_id(1)                 # expert index     ("arbitrary")
    n_e = pl.num_programs(1)

    @pl.when(e == 0)
    def _init():
        acc_ref[...] = jnp.zeros_like(acc_ref)

    # Compute only if some token in this tile routed to expert e (the W1/W2
    # DMA is already elided for skipped experts via the widx index_map).
    @pl.when(flags_ref[i * n_e + e] > 0)
    def _compute():
        xb = x_ref[...].astype(jnp.bfloat16)
        h = jnp.dot(xb, w1_ref[0], preferred_element_type=jnp.float32) + b1_ref[0]
        h = jnp.maximum(h, 0.0)                                       # [tm, F]
        y = jnp.dot(h.astype(jnp.bfloat16), w2_ref[0],
                    preferred_element_type=jnp.float32) + b2_ref[0]   # [tm, dm]
        acc_ref[...] += c_ref[0] * y                                  # [tm,1]*[tm,dm]

    @pl.when(e == n_e - 1)
    def _store():
        z = x_ref[...] + acc_ref[...]                # residual x1 + ff
        mu = jnp.mean(z, axis=-1, keepdims=True)
        cen = z - mu
        var = jnp.mean(cen * cen, axis=-1, keepdims=True)
        o_ref[...] = (cen * jax.lax.rsqrt(var + ln_eps) * g2_ref[...]
                      + b2n_ref[...]).astype(o_ref.dtype)


def moe_feedforward_norm2(x, moe_p, norm2_p, *, tm_max=256, ln_eps=1e-5):
    B, T, dm = x.shape
    N = B * T
    E = moe_p["gw"].shape[1]
    F = moe_p["w1"].shape[2]
    tm = min(tm_max, N)
    assert N % tm == 0 and (tm == N or tm % 8 == 0)
    n_tiles = N // tm
    xf = x.reshape(N, dm)

    # Gating (softmax + top-2 + combine weights) in plain XLA f32: lane-sparse
    # [N, E] matmul + rank logic stay out of the hot kernel.
    logits = jnp.dot(xf, moe_p["gw"],
                     preferred_element_type=jnp.float32) + moe_p["gb"]
    scores = jax.nn.softmax(logits, axis=-1)
    top2_s, top2_i = jax.lax.top_k(scores, 2)
    combine = (jax.nn.one_hot(top2_i[:, 0], E, dtype=jnp.float32) * top2_s[:, 0:1]
               + jax.nn.one_hot(top2_i[:, 1], E, dtype=jnp.float32) * top2_s[:, 1:2])
    combine_t = combine.T.reshape(E, N, 1)                       # [E, N, 1]

    flags = jnp.any(combine.reshape(n_tiles, tm, E) > 0.0,
                    axis=1).reshape(-1).astype(jnp.int32)        # flat [tiles*E]
    # DMA-eliding weight block index: repeat the previous active expert's index
    # for skipped (tile, expert) steps so the W1/W2 DMA is skipped entirely.
    e_ids = jnp.tile(jnp.arange(E, dtype=jnp.int32), n_tiles)

    def _carry(prev, fe):
        f, e = fe
        cur = jnp.where(f > 0, e, prev)
        return cur, cur

    _, w_idx = jax.lax.scan(_carry, jnp.int32(0), (flags, e_ids))

    # bf16 weight storage / MXU compute, f32 accumulation.
    w1 = moe_p["w1"].astype(jnp.bfloat16)
    w2 = moe_p["w2"].astype(jnp.bfloat16)
    b1 = moe_p["b1"].astype(jnp.float32)
    b2 = moe_p["b2"].astype(jnp.float32)

    est = (4 * dm * F * 2                # W1 + W2, double-buffered, bf16
           + 4 * (F + dm) * 4            # b1 + b2, double-buffered
           + 4 * tm * dm * 4             # x + out tiles, double-buffered
           + 4 * tm * 4                  # combine column tile
           + tm * dm * 4                 # accumulator scratch
           + 2 * tm * F * 4              # [tm, F] ReLU intermediate headroom
           + 4 * dm * 4)                 # norm2 gamma/beta
    vmem_limit = _clamp_vmem_limit(2 * est)

    out = pl.pallas_call(
        partial(moe_norm2_kernel, ln_eps=ln_eps),
        out_shape=jax.ShapeDtypeStruct((N, dm), x.dtype),
        grid_spec=pltpu.PrefetchScalarGridSpec(
            num_scalar_prefetch=2,                     # flags, w_idx (SMEM)
            grid=(n_tiles, E),
            in_specs=[
                pl.BlockSpec((tm, dm), lambda i, e, flg, wix: (i, 0)),      # x1
                pl.BlockSpec((1, tm, 1), lambda i, e, flg, wix: (e, i, 0)), # combine
                pl.BlockSpec((1, dm, F),
                             lambda i, e, flg, wix, _E=E: (wix[i * _E + e], 0, 0)),
                pl.BlockSpec((1, 1, F),
                             lambda i, e, flg, wix, _E=E: (wix[i * _E + e], 0, 0)),
                pl.BlockSpec((1, F, dm),
                             lambda i, e, flg, wix, _E=E: (wix[i * _E + e], 0, 0)),
                pl.BlockSpec((1, 1, dm),
                             lambda i, e, flg, wix, _E=E: (wix[i * _E + e], 0, 0)),
                pl.BlockSpec((1, dm), lambda i, e, flg, wix: (0, 0)),       # g2
                pl.BlockSpec((1, dm), lambda i, e, flg, wix: (0, 0)),       # beta2
            ],
            out_specs=pl.BlockSpec((tm, dm), lambda i, e, flg, wix: (i, 0)),
            scratch_shapes=[pltpu.VMEM((tm, dm), jnp.float32)]),
        compiler_params=pltpu.CompilerParams(
            dimension_semantics=("parallel", "arbitrary"),
            vmem_limit_bytes=vmem_limit),
    )(flags, w_idx, xf, combine_t, w1, b1, w2, b2,
      norm2_p["gamma"], norm2_p["beta"])
    return out.reshape(B, T, dm)


# ---------------------------------------------------------------------------
# Full encoder layer forward (eval mode)
# ---------------------------------------------------------------------------
def transformer_moe_layer(src, frac, params, *, add_frac_bias=False, moe_tm=256):
    # dropout1 / dropout2 / attention dropout / gating noise: identity in eval.
    x1 = stoich_attention_norm1(src, frac, params["attn"], params["frac_mlp"],
                                params["norm1"], add_frac_bias=add_frac_bias)
    return moe_feedforward_norm2(x1, params["moe"], params["norm2"],
                                 tm_max=moe_tm)


# ---------------------------------------------------------------------------
# Pure-JAX reference (mirrors the PyTorch forward in eval mode; matmuls use
# the same bf16-MXU / f32-accumulate precision choice as the kernels).
# ---------------------------------------------------------------------------
def _zscore_ref(t, eps=1e-5):
    mean = jnp.mean(t, axis=-1, keepdims=True)
    std = jnp.std(t, axis=-1, keepdims=True, ddof=1)
    return (t - mean) / (std + eps)


def attention_reference(x, frac, p, add_frac_bias, cd=jnp.bfloat16):
    B, T, dm = x.shape
    H = p["alpha_pos"].shape[0]
    hd = dm // H
    xb = x.astype(cd)

    def proj(w, b):
        return (jnp.einsum("btd,de->bte", xb, w.astype(cd),
                           preferred_element_type=jnp.float32) + b)

    q = proj(p["wq"], p["bq"]).reshape(B, T, H, hd).transpose(0, 2, 1, 3)
    k = proj(p["wk"], p["bk"]).reshape(B, T, H, hd).transpose(0, 2, 1, 3)
    v = proj(p["wv"], p["bv"]).reshape(B, T, H, hd).transpose(0, 2, 1, 3)
    logits = jnp.einsum("bhqd,bhkd->bhqk", q.astype(cd), k.astype(cd),
                        preferred_element_type=jnp.float32) * (float(hd) ** -0.5)
    w = p["gamma"][0] * _zscore_ref(logits)
    if add_frac_bias:
        fi = frac[:, :, None]
        fj = frac[:, None, :]
        dmat = (fj - fi) / (fi * fj + 1e-8)
        d_pos = jnp.maximum(dmat, 0.0)
        d_neg = jnp.minimum(dmat, 0.0)
        bias = (p["alpha_pos"][None, :, None, None] * d_pos[:, None]
                + p["alpha_neg"][None, :, None, None] * d_neg[:, None])
        w = w + p["delta"][0] * _zscore_ref(bias)
    probs = jax.nn.softmax(w, axis=-1)
    out = jnp.einsum("bhqk,bhkd->bhqd", probs.astype(cd), v.astype(cd),
                     preferred_element_type=jnp.float32)
    out = out.transpose(0, 2, 1, 3).reshape(B, T, dm)
    return (jnp.einsum("btd,de->bte", out.astype(cd), p["wo"].astype(cd),
                       preferred_element_type=jnp.float32) + p["bo"])


def layernorm_reference(x, p, eps=1e-5):
    mean = jnp.mean(x, axis=-1, keepdims=True)
    var = jnp.mean((x - mean) ** 2, axis=-1, keepdims=True)
    return (x - mean) * jax.lax.rsqrt(var + eps) * p["gamma"] + p["beta"]


def stoich_bias_reference(frac, p, cd=jnp.bfloat16):
    B, T = frac.shape
    f = frac.reshape(B * T, 1)
    h = jnp.maximum(f * p["w1"] + p["b1"], 0.0)
    out = (jnp.dot(h.astype(cd), p["w2"].astype(cd),
                   preferred_element_type=jnp.float32) + p["b2"])
    return out.reshape(B, T, -1)


def moe_reference(x, p, cd=jnp.bfloat16):
    B, T, dm = x.shape
    E = p["gw"].shape[1]
    xf = x.reshape(B * T, dm)
    logits = jnp.dot(xf, p["gw"], preferred_element_type=jnp.float32) + p["gb"]
    scores = jax.nn.softmax(logits, axis=-1)
    top2_s, top2_i = jax.lax.top_k(scores, 2)
    combine = (jax.nn.one_hot(top2_i[:, 0], E, dtype=jnp.float32) * top2_s[:, 0:1]
               + jax.nn.one_hot(top2_i[:, 1], E, dtype=jnp.float32) * top2_s[:, 1:2])
    xb = xf.astype(cd)
    out = jnp.zeros((B * T, dm), jnp.float32)
    for e in range(E):
        h = jnp.maximum(jnp.dot(xb, p["w1"][e].astype(cd),
                                preferred_element_type=jnp.float32) + p["b1"][e], 0.0)
        y = jnp.dot(h.astype(cd), p["w2"][e].astype(cd),
                    preferred_element_type=jnp.float32) + p["b2"][e]
        out = out + combine[:, e:e + 1] * y
    return out.reshape(B, T, dm)


def layer_reference(src, frac, params, *, add_frac_bias):
    attn_out = attention_reference(src, frac, params["attn"], add_frac_bias)
    resid = src + attn_out
    if add_frac_bias:
        resid = resid + stoich_bias_reference(frac, params["frac_mlp"])
    x1 = layernorm_reference(resid, params["norm1"])
    ff = moe_reference(x1, params["moe"])
    return layernorm_reference(x1 + ff, params["norm2"])


# ---------------------------------------------------------------------------
# Deterministic synthetic parameters (torch-Linear-like uniform bounds)
# ---------------------------------------------------------------------------
def init_layer_params(key, d_model, d_ff, nhead, num_experts):
    keys = iter(jax.random.split(key, 32))

    def u(shape, fan_in):
        bound = float(fan_in) ** -0.5
        return jax.random.uniform(next(keys), shape, jnp.float32, -bound, bound)

    attn = {
        "wq": u((d_model, d_model), d_model), "bq": u((1, d_model), d_model),
        "wk": u((d_model, d_model), d_model), "bk": u((1, d_model), d_model),
        "wv": u((d_model, d_model), d_model), "bv": u((1, d_model), d_model),
        "wo": u((d_model, d_model), d_model), "bo": u((1, d_model), d_model),
        # torch inits alpha_pos/alpha_neg to zero; use small random values so
        # the stoichiometric-bias path is exercised numerically.
        "alpha_pos": jax.random.uniform(next(keys), (nhead,), jnp.float32, -0.5, 0.5),
        "alpha_neg": jax.random.uniform(next(keys), (nhead,), jnp.float32, -0.5, 0.5),
        "gamma": jnp.array([1.0], jnp.float32),
        "delta": jnp.array([0.2], jnp.float32),
    }

    def norm():
        return {"gamma": jnp.ones((1, d_model), jnp.float32),
                "beta": jnp.zeros((1, d_model), jnp.float32)}

    frac_mlp = {"w1": u((1, d_model), 1), "b1": u((1, d_model), 1),
                "w2": u((d_model, d_model), d_model),
                "b2": u((1, d_model), d_model)}
    moe = {"gw": u((d_model, num_experts), d_model),
           "gb": u((1, num_experts), d_model),
           "w1": u((num_experts, d_model, d_ff), d_model),
           "b1": u((num_experts, 1, d_ff), d_model),
           "w2": u((num_experts, d_ff, d_model), d_ff),
           "b2": u((num_experts, 1, d_model), d_ff)}
    return {"attn": attn, "norm1": norm(), "norm2": norm(),
            "frac_mlp": frac_mlp, "moe": moe}


if __name__ == "__main__":
    B, T, D_MODEL, D_FF, NHEAD, N_EXPERTS = 2, 8, 32, 64, 4, 4

    key = jax.random.PRNGKey(0)
    k_x, k_f, k_p = jax.random.split(key, 3)
    src = jax.random.normal(k_x, (B, T, D_MODEL), jnp.float32)
    frac = jax.random.uniform(k_f, (B, T), jnp.float32, 0.05, 1.0)
    params = init_layer_params(k_p, D_MODEL, D_FF, NHEAD, N_EXPERTS)

    out = transformer_moe_layer(src, frac, params, add_frac_bias=True)
    out = jax.block_until_ready(out)

    ref = layer_reference(src, frac, params, add_frac_bias=True)
    assert out.shape == (B, T, D_MODEL)
    max_err = float(jnp.max(jnp.abs(out - ref)))
    assert jnp.allclose(out, ref, rtol=2e-2, atol=2e-2), \
        f"mismatch vs reference (max abs err {max_err})"
    print("KERNEL_OK")
</pallas_src>

<mosaic_0001>
module attributes {stable_mosaic.version = 11 : i64} {
  func.func @attn_norm1_kernel(%arg0: i32, %arg1: memref<1x8x32xf32, #tpu.memory_space<vmem>>, %arg2: memref<32x32xbf16, #tpu.memory_space<vmem>>, %arg3: memref<32x32xbf16, #tpu.memory_space<vmem>>, %arg4: memref<32x32xbf16, #tpu.memory_space<vmem>>, %arg5: memref<32x32xbf16, #tpu.memory_space<vmem>>, %arg6: memref<1x32xf32, #tpu.memory_space<vmem>>, %arg7: memref<1x32xf32, #tpu.memory_space<vmem>>, %arg8: memref<1x32xf32, #tpu.memory_space<vmem>>, %arg9: memref<1x32xf32, #tpu.memory_space<vmem>>, %arg10: memref<1x8x1xf32, #tpu.memory_space<vmem>>, %arg11: memref<1x1x8xf32, #tpu.memory_space<vmem>>, %arg12: memref<4xf32, #tpu.memory_space<smem>>, %arg13: memref<4xf32, #tpu.memory_space<smem>>, %arg14: memref<1xf32, #tpu.memory_space<smem>>, %arg15: memref<1xf32, #tpu.memory_space<smem>>, %arg16: memref<1x32xf32, #tpu.memory_space<vmem>>, %arg17: memref<1x32xf32, #tpu.memory_space<vmem>>, %arg18: memref<32x32xbf16, #tpu.memory_space<vmem>>, %arg19: memref<1x32xf32, #tpu.memory_space<vmem>>, %arg20: memref<1x32xf32, #tpu.memory_space<vmem>>, %arg21: memref<1x32xf32, #tpu.memory_space<vmem>>, %arg22: memref<1x8x32xf32, #tpu.memory_space<vmem>>, %arg23: memref<8x32xbf16, #tpu.memory_space<vmem>>, %arg24: memref<8x32xbf16, #tpu.memory_space<vmem>>, %arg25: memref<8x32xbf16, #tpu.memory_space<vmem>>, %arg26: memref<8x32xf32, #tpu.memory_space<vmem>>) attributes {dimension_semantics = [#tpu.dimension_semantics<parallel>], iteration_bounds = array<i64: 2>, scalar_prefetch = 0 : i64, scratch_operands = 4 : i64, tpu.core_type = #tpu.core_type<tc>, window_params = [{transform_indices = @transform_0, window_bounds = array<i64: 1, 8, 32>}, {pipeline_mode = #tpu.pipeline_mode<synchronous>, transform_indices = @transform_1, window_bounds = array<i64: 32, 32>}, {pipeline_mode = #tpu.pipeline_mode<synchronous>, transform_indices = @transform_2, window_bounds = array<i64: 32, 32>}, {pipeline_mode = #tpu.pipeline_mode<synchronous>, transform_indices = @transform_3, window_bounds = array<i64: 32, 32>}, {pipeline_mode = #tpu.pipeline_mode<synchronous>, transform_indices = @transform_4, window_bounds = array<i64: 32, 32>}, {pipeline_mode = #tpu.pipeline_mode<synchronous>, transform_indices = @transform_5, window_bounds = array<i64: 1, 32>}, {pipeline_mode = #tpu.pipeline_mode<synchronous>, transform_indices = @transform_6, window_bounds = array<i64: 1, 32>}, {pipeline_mode = #tpu.pipeline_mode<synchronous>, transform_indices = @transform_7, window_bounds = array<i64: 1, 32>}, {pipeline_mode = #tpu.pipeline_mode<synchronous>, transform_indices = @transform_8, window_bounds = array<i64: 1, 32>}, {transform_indices = @transform_9, window_bounds = array<i64: 1, 8, 1>}, {transform_indices = @transform_10, window_bounds = array<i64: 1, 1, 8>}, {transform_indices = @transform_11, window_bounds = array<i64: 4>}, {transform_indices = @transform_12, window_bounds = array<i64: 4>}, {transform_indices = @transform_13, window_bounds = array<i64: 1>}, {transform_indices = @transform_14, window_bounds = array<i64: 1>}, {pipeline_mode = #tpu.pipeline_mode<synchronous>, transform_indices = @transform_15, window_bounds = array<i64: 1, 32>}, {pipeline_mode = #tpu.pipeline_mode<synchronous>, transform_indices = @transform_16, window_bounds = array<i64: 1, 32>}, {pipeline_mode = #tpu.pipeline_mode<synchronous>, transform_indices = @transform_17, window_bounds = array<i64: 32, 32>}, {pipeline_mode = #tpu.pipeline_mode<synchronous>, transform_indices = @transform_18, window_bounds = array<i64: 1, 32>}, {pipeline_mode = #tpu.pipeline_mode<synchronous>, transform_indices = @transform_19, window_bounds = array<i64: 1, 32>}, {pipeline_mode = #tpu.pipeline_mode<synchronous>, transform_indices = @transform_20, window_bounds = array<i64: 1, 32>}, {transform_indices = @transform_21, window_bounds = array<i64: 1, 8, 32>}]} {
    %c0 = arith.constant 0 : index
    %c0_0 = arith.constant 0 : index
    %c0_1 = arith.constant 0 : index
    %0 = vector.load %arg1[%c0, %c0_0, %c0_1] : memref<1x8x32xf32, #tpu.memory_space<vmem>>, vector<1x8x32xf32>
    %1 = vector.shape_cast %0 : vector<1x8x32xf32> to vector<8x32xf32>
    %c0_2 = arith.constant 0 : index
    %2 = memref.load %arg14[%c0_2] : memref<1xf32, #tpu.memory_space<smem>>
    %c0_3 = arith.constant 0 : index
    %3 = memref.load %arg15[%c0_3] : memref<1xf32, #tpu.memory_space<smem>>
    %4 = arith.truncf %1 : vector<8x32xf32> to vector<8x32xbf16>
    %c0_4 = arith.constant 0 : index
    %c0_5 = arith.constant 0 : index
    %5 = vector.load %arg2[%c0_4, %c0_5] : memref<32x32xbf16, #tpu.memory_space<vmem>>, vector<32x32xbf16>
    %cst = arith.constant dense<0.000000e+00> : vector<8x32xf32>
    %6 = tpu.matmul %4, %5, %cst {dimension_numbers = #tpu.dot_dimension_numbers<[1], [0], [0], [1], [0, 0, 1, 1], [], []>} : vector<8x32xbf16>, vector<32x32xbf16>, vector<8x32xf32> -> vector<8x32xf32>
    %c0_6 = arith.constant 0 : index
    %c0_7 = arith.constant 0 : index
    %7 = vector.load %arg6[%c0_6, %c0_7] : memref<1x32xf32, #tpu.memory_space<vmem>>, vector<1x32xf32>
    %8 = vector.broadcast %7 : vector<1x32xf32> to vector<8x32xf32>
    %9 = arith.addf %6, %8 : vector<8x32xf32>
    %10 = arith.truncf %9 : vector<8x32xf32> to vector<8x32xbf16>
    %c0_8 = arith.constant 0 : index
    %c0_9 = arith.constant 0 : index
    %11 = vector.load %arg23[%c0_8, %c0_9] : memref<8x32xbf16, #tpu.memory_space<vmem>>, vector<8x32xbf16>
    tpu.vector_store %arg23[%c0_8, %c0_9], %10 {strides = array<i32>} : memref<8x32xbf16, #tpu.memory_space<vmem>>, vector<8x32xbf16>,
    %c0_10 = arith.constant 0 : index
    %c0_11 = arith.constant 0 : index
    %12 = vector.load %arg3[%c0_10, %c0_11] : memref<32x32xbf16, #tpu.memory_space<vmem>>, vector<32x32xbf16>
    %cst_12 = arith.constant dense<0.000000e+00> : vector<8x32xf32>
    %13 = tpu.matmul %4, %12, %cst_12 {dimension_numbers = #tpu.dot_dimension_numbers<[1], [0], [0], [1], [0, 0, 1, 1], [], []>} : vector<8x32xbf16>, vector<32x32xbf16>, vector<8x32xf32> -> vector<8x32xf32>
    %c0_13 = arith.constant 0 : index
    %c0_14 = arith.constant 0 : index
    %14 = vector.load %arg7[%c0_13, %c0_14] : memref<1x32xf32, #tpu.memory_space<vmem>>, vector<1x32xf32>
    %15 = vector.broadcast %14 : vector<1x32xf32> to vector<8x32xf32>
    %16 = arith.addf %13, %15 : vector<8x32xf32>
    %17 = arith.truncf %16 : vector<8x32xf32> to vector<8x32xbf16>
    %c0_15 = arith.constant 0 : index
    %c0_16 = arith.constant 0 : index
    %18 = vector.load %arg24[%c0_15, %c0_16] : memref<8x32xbf16, #tpu.memory_space<vmem>>, vector<8x32xbf16>
    tpu.vector_store %arg24[%c0_15, %c0_16], %17 {strides = array<i32>} : memref<8x32xbf16, #tpu.memory_space<vmem>>, vector<8x32xbf16>,
    %c0_17 = arith.constant 0 : index
    %c0_18 = arith.constant 0 : index
    %19 = vector.load %arg4[%c0_17, %c0_18] : memref<32x32xbf16, #tpu.memory_space<vmem>>, vector<32x32xbf16>
    %cst_19 = arith.constant dense<0.000000e+00> : vector<8x32xf32>
    %20 = tpu.matmul %4, %19, %cst_19 {dimension_numbers = #tpu.dot_dimension_numbers<[1], [0], [0], [1], [0, 0, 1, 1], [], []>} : vector<8x32xbf16>, vector<32x32xbf16>, vector<8x32xf32> -> vector<8x32xf32>
    %c0_20 = arith.constant 0 : index
    %c0_21 = arith.constant 0 : index
    %21 = vector.load %arg8[%c0_20, %c0_21] : memref<1x32xf32, #tpu.memory_space<vmem>>, vector<1x32xf32>
    %22 = vector.broadcast %21 : vector<1x32xf32> to vector<8x32xf32>
    %23 = arith.addf %20, %22 : vector<8x32xf32>
    %24 = arith.truncf %23 : vector<8x32xf32> to vector<8x32xbf16>
    %c0_22 = arith.constant 0 : index
    %c0_23 = arith.constant 0 : index
    %25 = vector.load %arg25[%c0_22, %c0_23] : memref<8x32xbf16, #tpu.memory_space<vmem>>, vector<8x32xbf16>
    tpu.vector_store %arg25[%c0_22, %c0_23], %24 {strides = array<i32>} : memref<8x32xbf16, #tpu.memory_space<vmem>>, vector<8x32xbf16>,
    %c0_24 = arith.constant 0 : index
    %c0_25 = arith.constant 0 : index
    %c0_26 = arith.constant 0 : index
    %26 = vector.load %arg10[%c0_24, %c0_25, %c0_26] : memref<1x8x1xf32, #tpu.memory_space<vmem>>, vector<1x8x1xf32>
    %27 = vector.shape_cast %26 : vector<1x8x1xf32> to vector<8x1xf32>
    %c0_27 = arith.constant 0 : index
    %c0_28 = arith.constant 0 : index
    %c0_29 = arith.constant 0 : index
    %28 = vector.load %arg11[%c0_27, %c0_28, %c0_29] : memref<1x1x8xf32, #tpu.memory_space<vmem>>, vector<1x1x8xf32>
    %29 = vector.shape_cast %28 : vector<1x1x8xf32> to vector<1x8xf32>
    %30 = vector.broadcast %29 : vector<1x8xf32> to vector<8x8xf32>
    %31 = vector.broadcast %27 : vector<8x1xf32> to vector<8x8xf32>
    %32 = arith.subf %30, %31 : vector<8x8xf32>
    %33 = vector.broadcast %27 : vector<8x1xf32> to vector<8x8xf32>
    %34 = vector.broadcast %29 : vector<1x8xf32> to vector<8x8xf32>
    %35 = arith.mulf %33, %34 : vector<8x8xf32>
    %cst_30 = arith.constant 9.99999993E-9 : f32
    %36 = vector.broadcast %cst_30 : f32 to vector<8x8xf32>
    %37 = arith.addf %35, %36 : vector<8x8xf32>
    %38 = tpu.reciprocal %37 {approx = true} : vector<8x8xf32> -> vector<8x8xf32>
    %39 = arith.mulf %32, %38 : vector<8x8xf32>
    %cst_31 = arith.constant 0.000000e+00 : f32
    %40 = vector.broadcast %cst_31 : f32 to vector<8x8xf32>
    %41 = arith.maximumf %39, %40 : vector<8x8xf32>
    %cst_32 = arith.constant 0.000000e+00 : f32
    %42 = vector.broadcast %cst_32 : f32 to vector<8x8xf32>
    %43 = arith.minimumf %39, %42 : vector<8x8xf32>
    %cst_33 = arith.constant dense<0.000000e+00> : vector<8xf32>
    %44 = vector.multi_reduction <add>, %41, %cst_33 [1] : vector<8x8xf32> to vector<8xf32>
    %45 = vector.shape_cast %44 : vector<8xf32> to vector<8x1xf32>
    %cst_34 = arith.constant dense<0.000000e+00> : vector<8xf32>
    %46 = vector.multi_reduction <add>, %43, %cst_34 [1] : vector<8x8xf32> to vector<8xf32>
    %47 = vector.shape_cast %46 : vector<8xf32> to vector<8x1xf32>
    %48 = arith.mulf %41, %41 : vector<8x8xf32>
    %cst_35 = arith.constant dense<0.000000e+00> : vector<8xf32>
    %49 = vector.multi_reduction <add>, %48, %cst_35 [1] : vector<8x8xf32> to vector<8xf32>
    %50 = vector.shape_cast %49 : vector<8xf32> to vector<8x1xf32>
    %51 = arith.mulf %43, %43 : vector<8x8xf32>
    %cst_36 = arith.constant dense<0.000000e+00> : vector<8xf32>
    %52 = vector.multi_reduction <add>, %51, %cst_36 [1] : vector<8x8xf32> to vector<8xf32>
    %53 = vector.shape_cast %52 : vector<8xf32> to vector<8x1xf32>
    %c0_37 = arith.constant 0 : index
    %c0_38 = arith.constant 0 : index
    %54 = vector.load %arg23[%c0_37, %c0_38] : memref<8x32xbf16, #tpu.memory_space<vmem>>, vector<8x8xbf16>
    %c0_39 = arith.constant 0 : index
    %c0_40 = arith.constant 0 : index
    %55 = vector.load %arg24[%c0_39, %c0_40] : memref<8x32xbf16, #tpu.memory_space<vmem>>, vector<8x8xbf16>
    %cst_41 = arith.constant dense<0.000000e+00> : vector<8x8xf32>
    %56 = tpu.matmul %54, %55, %cst_41 {dimension_numbers = #tpu.dot_dimension_numbers<[1], [1], [0], [0], [0, 0, 1, 0], [], []>} : vector<8x8xbf16>, vector<8x8xbf16>, vector<8x8xf32> -> vector<8x8xf32>
    %cst_42 = arith.constant 0.353553385 : f32
    %57 = vector.broadcast %cst_42 : f32 to vector<8x8xf32>
    %58 = arith.mulf %56, %57 : vector<8x8xf32>
    %cst_43 = arith.constant dense<0.000000e+00> : vector<8xf32>
    %59 = vector.multi_reduction <add>, %58, %cst_43 [1] : vector<8x8xf32> to vector<8xf32>
    %60 = vector.shape_cast %59 : vector<8xf32> to vector<8x1xf32>
    %cst_44 = arith.constant 8.000000e+00 : f32
    %61 = vector.broadcast %cst_44 : f32 to vector<8x1xf32>
    %62 = arith.divf %60, %61 : vector<8x1xf32>
    %63 = vector.broadcast %62 : vector<8x1xf32> to vector<8x8xf32>
    %64 = arith.subf %58, %63 : vector<8x8xf32>
    %65 = arith.mulf %64, %64 : vector<8x8xf32>
    %cst_45 = arith.constant dense<0.000000e+00> : vector<8xf32>
    %66 = vector.multi_reduction <add>, %65, %cst_45 [1] : vector<8x8xf32> to vector<8xf32>
    %67 = vector.shape_cast %66 : vector<8xf32> to vector<8x1xf32>
    %cst_46 = arith.constant 0.142857149 : f32
    %68 = vector.broadcast %cst_46 : f32 to vector<8x1xf32>
    %69 = arith.mulf %67, %68 : vector<8x1xf32>
    %70 = math.sqrt %69 : vector<8x1xf32>
    %cst_47 = arith.constant 9.99999974E-6 : f32
    %71 = vector.broadcast %cst_47 : f32 to vector<8x1xf32>
    %72 = arith.addf %70, %71 : vector<8x1xf32>
    %73 = tpu.reciprocal %72 {approx = true} : vector<8x1xf32> -> vector<8x1xf32>
    %74 = vector.broadcast %73 : vector<8x1xf32> to vector<8x8xf32>
    %75 = arith.mulf %64, %74 : vector<8x8xf32>
    %76 = vector.broadcast %2 : f32 to vector<8x8xf32>
    %77 = arith.mulf %76, %75 : vector<8x8xf32>
    %c0_48 = arith.constant 0 : index
    %78 = memref.load %arg12[%c0_48] : memref<4xf32, #tpu.memory_space<smem>>
    %c0_49 = arith.constant 0 : index
    %79 = memref.load %arg13[%c0_49] : memref<4xf32, #tpu.memory_space<smem>>
    %80 = vector.broadcast %78 : f32 to vector<8x1xf32>
    %81 = arith.mulf %80, %45 : vector<8x1xf32>
    %82 = vector.broadcast %79 : f32 to vector<8x1xf32>
    %83 = arith.mulf %82, %47 : vector<8x1xf32>
    %84 = arith.addf %81, %83 : vector<8x1xf32>
    %cst_50 = arith.constant 1.250000e-01 : f32
    %85 = vector.broadcast %cst_50 : f32 to vector<8x1xf32>
    %86 = arith.mulf %84, %85 : vector<8x1xf32>
    %87 = arith.mulf %78, %78 : f32
    %88 = vector.broadcast %87 : f32 to vector<8x1xf32>
    %89 = arith.mulf %88, %50 : vector<8x1xf32>
    %90 = arith.mulf %79, %79 : f32
    %91 = vector.broadcast %90 : f32 to vector<8x1xf32>
    %92 = arith.mulf %91, %53 : vector<8x1xf32>
    %93 = arith.addf %89, %92 : vector<8x1xf32>
    %cst_51 = arith.constant 8.000000e+00 : f32
    %94 = vector.broadcast %cst_51 : f32 to vector<8x1xf32>
    %95 = arith.mulf %94, %86 : vector<8x1xf32>
    %96 = arith.mulf %95, %86 : vector<8x1xf32>
    %97 = arith.subf %93, %96 : vector<8x1xf32>
    %cst_52 = arith.constant 0.000000e+00 : f32
    %98 = vector.broadcast %cst_52 : f32 to vector<8x1xf32>
    %99 = arith.maximumf %97, %98 : vector<8x1xf32>
    %cst_53 = arith.constant 0.142857149 : f32
    %100 = vector.broadcast %cst_53 : f32 to vector<8x1xf32>
    %101 = arith.mulf %99, %100 : vector<8x1xf32>
    %102 = math.sqrt %101 : vector<8x1xf32>
    %cst_54 = arith.constant 9.99999974E-6 : f32
    %103 = vector.broadcast %cst_54 : f32 to vector<8x1xf32>
    %104 = arith.addf %102, %103 : vector<8x1xf32>
    %105 = tpu.reciprocal %104 {approx = true} : vector<8x1xf32> -> vector<8x1xf32>
    %106 = vector.broadcast %3 : f32 to vector<8x1xf32>
    %107 = arith.mulf %106, %105 : vector<8x1xf32>
    %108 = vector.broadcast %78 : f32 to vector<8x1xf32>
    %109 = arith.mulf %108, %107 : vector<8x1xf32>
    %110 = vector.broadcast %109 : vector<8x1xf32> to vector<8x8xf32>
    %111 = arith.mulf %110, %41 : vector<8x8xf32>
    %112 = arith.addf %77, %111 : vector<8x8xf32>
    %113 = vector.broadcast %79 : f32 to vector<8x1xf32>
    %114 = arith.mulf %113, %107 : vector<8x1xf32>
    %115 = vector.broadcast %114 : vector<8x1xf32> to vector<8x8xf32>
    %116 = arith.mulf %115, %43 : vector<8x8xf32>
    %117 = arith.addf %112, %116 : vector<8x8xf32>
    %118 = arith.mulf %86, %107 : vector<8x1xf32>
    %119 = vector.broadcast %118 : vector<8x1xf32> to vector<8x8xf32>
    %120 = arith.subf %117, %119 : vector<8x8xf32>
    %cst_55 = arith.constant dense<0xFF800000> : vector<8xf32>
    %121 = vector.multi_reduction <maximumf>, %120, %cst_55 [1] : vector<8x8xf32> to vector<8xf32>
    %122 = vector.shape_cast %121 : vector<8xf32> to vector<8x1xf32>
    %123 = vector.broadcast %122 : vector<8x1xf32> to vector<8x8xf32>
    %124 = arith.subf %120, %123 : vector<8x8xf32>
    %125 = math.exp %124 : vector<8x8xf32>
    %cst_56 = arith.constant dense<0.000000e+00> : vector<8xf32>
    %126 = vector.multi_reduction <add>, %125, %cst_56 [1] : vector<8x8xf32> to vector<8xf32>
    %127 = vector.shape_cast %126 : vector<8xf32> to vector<8x1xf32>
    %128 = tpu.reciprocal %127 {approx = true} : vector<8x1xf32> -> vector<8x1xf32>
    %129 = vector.broadcast %128 : vector<8x1xf32> to vector<8x8xf32>
    %130 = arith.mulf %125, %129 : vector<8x8xf32>
    %131 = arith.truncf %130 : vector<8x8xf32> to vector<8x8xbf16>
    %c0_57 = arith.constant 0 : index
    %c0_58 = arith.constant 0 : index
    %132 = vector.load %arg25[%c0_57, %c0_58] : memref<8x32xbf16, #tpu.memory_space<vmem>>, vector<8x8xbf16>
    %cst_59 = arith.constant dense<0.000000e+00> : vector<8x8xf32>
    %133 = tpu.matmul %131, %132, %cst_59 {dimension_numbers = #tpu.dot_dimension_numbers<[1], [0], [0], [1], [0, 0, 1, 1], [], []>} : vector<8x8xbf16>, vector<8x8xbf16>, vector<8x8xf32> -> vector<8x8xf32>
    %c0_60 = arith.constant 0 : index
    %c0_61 = arith.constant 0 : index
    %134 = vector.load %arg26[%c0_60, %c0_61] : memref<8x32xf32, #tpu.memory_space<vmem>>, vector<8x8xf32>
    tpu.vector_store %arg26[%c0_60, %c0_61], %133 {strides = array<i32>} : memref<8x32xf32, #tpu.memory_space<vmem>>, vector<8x8xf32>,
    %c0_62 = arith.constant 0 : index
    %c8 = arith.constant 8 : index
    %135 = vector.load %arg23[%c0_62, %c8] : memref<8x32xbf16, #tpu.memory_space<vmem>>, vector<8x8xbf16>
    %c0_63 = arith.constant 0 : index
    %c8_64 = arith.constant 8 : index
    %136 = vector.load %arg24[%c0_63, %c8_64] : memref<8x32xbf16, #tpu.memory_space<vmem>>, vector<8x8xbf16>
    %cst_65 = arith.constant dense<0.000000e+00> : vector<8x8xf32>
    %137 = tpu.matmul %135, %136, %cst_65 {dimension_numbers = #tpu.dot_dimension_numbers<[1], [1], [0], [0], [0, 0, 1, 0], [], []>} : vector<8x8xbf16>, vector<8x8xbf16>, vector<8x8xf32> -> vector<8x8xf32>
    %cst_66 = arith.constant 0.353553385 : f32
    %138 = vector.broadcast %cst_66 : f32 to vector<8x8xf32>
    %139 = arith.mulf %137, %138 : vector<8x8xf32>
    %cst_67 = arith.constant dense<0.000000e+00> : vector<8xf32>
    %140 = vector.multi_reduction <add>, %139, %cst_67 [1] : vector<8x8xf32> to vector<8xf32>
    %141 = vector.shape_cast %140 : vector<8xf32> to vector<8x1xf32>
    %cst_68 = arith.constant 8.000000e+00 : f32
    %142 = vector.broadcast %cst_68 : f32 to vector<8x1xf32>
    %143 = arith.divf %141, %142 : vector<8x1xf32>
    %144 = vector.broadcast %143 : vector<8x1xf32> to vector<8x8xf32>
    %145 = arith.subf %139, %144 : vector<8x8xf32>
    %146 = arith.mulf %145, %145 : vector<8x8xf32>
    %cst_69 = arith.constant dense<0.000000e+00> : vector<8xf32>
    %147 = vector.multi_reduction <add>, %146, %cst_69 [1] : vector<8x8xf32> to vector<8xf32>
    %148 = vector.shape_cast %147 : vector<8xf32> to vector<8x1xf32>
    %cst_70 = arith.constant 0.142857149 : f32
    %149 = vector.broadcast %cst_70 : f32 to vector<8x1xf32>
    %150 = arith.mulf %148, %149 : vector<8x1xf32>
    %151 = math.sqrt %150 : vector<8x1xf32>
    %cst_71 = arith.constant 9.99999974E-6 : f32
    %152 = vector.broadcast %cst_71 : f32 to vector<8x1xf32>
    %153 = arith.addf %151, %152 : vector<8x1xf32>
    %154 = tpu.reciprocal %153 {approx = true} : vector<8x1xf32> -> vector<8x1xf32>
    %155 = vector.broadcast %154 : vector<8x1xf32> to vector<8x8xf32>
    %156 = arith.mulf %145, %155 : vector<8x8xf32>
    %157 = vector.broadcast %2 : f32 to vector<8x8xf32>
    %158 = arith.mulf %157, %156 : vector<8x8xf32>
    %c1 = arith.constant 1 : index
    %159 = memref.load %arg12[%c1] : memref<4xf32, #tpu.memory_space<smem>>
    %c1_72 = arith.constant 1 : index
    %160 = memref.load %arg13[%c1_72] : memref<4xf32, #tpu.memory_space<smem>>
    %161 = vector.broadcast %159 : f32 to vector<8x1xf32>
    %162 = arith.mulf %161, %45 : vector<8x1xf32>
    %163 = vector.broadcast %160 : f32 to vector<8x1xf32>
    %164 = arith.mulf %163, %47 : vector<8x1xf32>
    %165 = arith.addf %162, %164 : vector<8x1xf32>
    %cst_73 = arith.constant 1.250000e-01 : f32
    %166 = vector.broadcast %cst_73 : f32 to vector<8x1xf32>
    %167 = arith.mulf %165, %166 : vector<8x1xf32>
    %168 = arith.mulf %159, %159 : f32
    %169 = vector.broadcast %168 : f32 to vector<8x1xf32>
    %170 = arith.mulf %169, %50 : vector<8x1xf32>
    %171 = arith.mulf %160, %160 : f32
    %172 = vector.broadcast %171 : f32 to vector<8x1xf32>
    %173 = arith.mulf %172, %53 : vector<8x1xf32>
    %174 = arith.addf %170, %173 : vector<8x1xf32>
    %cst_74 = arith.constant 8.000000e+00 : f32
    %175 = vector.broadcast %cst_74 : f32 to vector<8x1xf32>
    %176 = arith.mulf %175, %167 : vector<8x1xf32>
    %177 = arith.mulf %176, %167 : vector<8x1xf32>
    %178 = arith.subf %174, %177 : vector<8x1xf32>
    %cst_75 = arith.constant 0.000000e+00 : f32
    %179 = vector.broadcast %cst_75 : f32 to vector<8x1xf32>
    %180 = arith.maximumf %178, %179 : vector<8x1xf32>
    %cst_76 = arith.constant 0.142857149 : f32
    %181 = vector.broadcast %cst_76 : f32 to vector<8x1xf32>
    %182 = arith.mulf %180, %181 : vector<8x1xf32>
    %183 = math.sqrt %182 : vector<8x1xf32>
    %cst_77 = arith.constant 9.99999974E-6 : f32
    %184 = vector.broadcast %cst_77 : f32 to vector<8x1xf32>
    %185 = arith.addf %183, %184 : vector<8x1xf32>
    %186 = tpu.reciprocal %185 {approx = true} : vector<8x1xf32> -> vector<8x1xf32>
    %187 = vector.broadcast %3 : f32 to vector<8x1xf32>
    %188 = arith.mulf %187, %186 : vector<8x1xf32>
    %189 = vector.broadcast %159 : f32 to vector<8x1xf32>
    %190 = arith.mulf %189, %188 : vector<8x1xf32>
    %191 = vector.broadcast %190 : vector<8x1xf32> to vector<8x8xf32>
    %192 = arith.mulf %191, %41 : vector<8x8xf32>
    %193 = arith.addf %158, %192 : vector<8x8xf32>
    %194 = vector.broadcast %160 : f32 to vector<8x1xf32>
    %195 = arith.mulf %194, %188 : vector<8x1xf32>
    %196 = vector.broadcast %195 : vector<8x1xf32> to vector<8x8xf32>
    %197 = arith.mulf %196, %43 : vector<8x8xf32>
    %198 = arith.addf %193, %197 : vector<8x8xf32>
    %199 = arith.mulf %167, %188 : vector<8x1xf32>
    %200 = vector.broadcast %199 : vector<8x1xf32> to vector<8x8xf32>
    %201 = arith.subf %198, %200 : vector<8x8xf32>
    %cst_78 = arith.constant dense<0xFF800000> : vector<8xf32>
    %202 = vector.multi_reduction <maximumf>, %201, %cst_78 [1] : vector<8x8xf32> to vector<8xf32>
    %203 = vector.shape_cast %202 : vector<8xf32> to vector<8x1xf32>
    %204 = vector.broadcast %203 : vector<8x1xf32> to vector<8x8xf32>
    %205 = arith.subf %201, %204 : vector<8x8xf32>
    %206 = math.exp %205 : vector<8x8xf32>
    %cst_79 = arith.constant dense<0.000000e+00> : vector<8xf32>
    %207 = vector.multi_reduction <add>, %206, %cst_79 [1] : vector<8x8xf32> to vector<8xf32>
    %208 = vector.shape_cast %207 : vector<8xf32> to vector<8x1xf32>
    %209 = tpu.reciprocal %208 {approx = true} : vector<8x1xf32> -> vector<8x1xf32>
    %210 = vector.broadcast %209 : vector<8x1xf32> to vector<8x8xf32>
    %211 = arith.mulf %206, %210 : vector<8x8xf32>
    %212 = arith.truncf %211 : vector<8x8xf32> to vector<8x8xbf16>
    %c0_80 = arith.constant 0 : index
    %c8_81 = arith.constant 8 : index
    %213 = vector.load %arg25[%c0_80, %c8_81] : memref<8x32xbf16, #tpu.memory_space<vmem>>, vector<8x8xbf16>
    %cst_82 = arith.constant dense<0.000000e+00> : vector<8x8xf32>
    %214 = tpu.matmul %212, %213, %cst_82 {dimension_numbers = #tpu.dot_dimension_numbers<[1], [0], [0], [1], [0, 0, 1, 1], [], []>} : vector<8x8xbf16>, vector<8x8xbf16>, vector<8x8xf32> -> vector<8x8xf32>
    %c0_83 = arith.constant 0 : index
    %c8_84 = arith.constant 8 : index
    %215 = vector.load %arg26[%c0_83, %c8_84] : memref<8x32xf32, #tpu.memory_space<vmem>>, vector<8x8xf32>
    tpu.vector_store %arg26[%c0_83, %c8_84], %214 {strides = array<i32>} : memref<8x32xf32, #tpu.memory_space<vmem>>, vector<8x8xf32>,
    %c0_85 = arith.constant 0 : index
    %c16 = arith.constant 16 : index
    %216 = vector.load %arg23[%c0_85, %c16] : memref<8x32xbf16, #tpu.memory_space<vmem>>, vector<8x8xbf16>
    %c0_86 = arith.constant 0 : index
    %c16_87 = arith.constant 16 : index
    %217 = vector.load %arg24[%c0_86, %c16_87] : memref<8x32xbf16, #tpu.memory_space<vmem>>, vector<8x8xbf16>
    %cst_88 = arith.constant dense<0.000000e+00> : vector<8x8xf32>
    %218 = tpu.matmul %216, %217, %cst_88 {dimension_numbers = #tpu.dot_dimension_numbers<[1], [1], [0], [0], [0, 0, 1, 0], [], []>} : vector<8x8xbf16>, vector<8x8xbf16>, vector<8x8xf32> -> vector<8x8xf32>
    %cst_89 = arith.constant 0.353553385 : f32
    %219 = vector.broadcast %cst_89 : f32 to vector<8x8xf32>
    %220 = arith.mulf %218, %219 : vector<8x8xf32>
    %cst_90 = arith.constant dense<0.000000e+00> : vector<8xf32>
    %221 = vector.multi_reduction <add>, %220, %cst_90 [1] : vector<8x8xf32> to vector<8xf32>
    %222 = vector.shape_cast %221 : vector<8xf32> to vector<8x1xf32>
    %cst_91 = arith.constant 8.000000e+00 : f32
    %223 = vector.broadcast %cst_91 : f32 to vector<8x1xf32>
    %224 = arith.divf %222, %223 : vector<8x1xf32>
    %225 = vector.broadcast %224 : vector<8x1xf32> to vector<8x8xf32>
    %226 = arith.subf %220, %225 : vector<8x8xf32>
    %227 = arith.mulf %226, %226 : vector<8x8xf32>
    %cst_92 = arith.constant dense<0.000000e+00> : vector<8xf32>
    %228 = vector.multi_reduction <add>, %227, %cst_92 [1] : vector<8x8xf32> to vector<8xf32>
    %229 = vector.shape_cast %228 : vector<8xf32> to vector<8x1xf32>
    %cst_93 = arith.constant 0.142857149 : f32
    %230 = vector.broadcast %cst_93 : f32 to vector<8x1xf32>
    %231 = arith.mulf %229, %230 : vector<8x1xf32>
    %232 = math.sqrt %231 : vector<8x1xf32>
    %cst_94 = arith.constant 9.99999974E-6 : f32
    %233 = vector.broadcast %cst_94 : f32 to vector<8x1xf32>
    %234 = arith.addf %232, %233 : vector<8x1xf32>
    %235 = tpu.reciprocal %234 {approx = true} : vector<8x1xf32> -> vector<8x1xf32>
    %236 = vector.broadcast %235 : vector<8x1xf32> to vector<8x8xf32>
    %237 = arith.mulf %226, %236 : vector<8x8xf32>
    %238 = vector.broadcast %2 : f32 to vector<8x8xf32>
    %239 = arith.mulf %238, %237 : vector<8x8xf32>
    %c2 = arith.constant 2 : index
    %240 = memref.load %arg12[%c2] : memref<4xf32, #tpu.memory_space<smem>>
    %c2_95 = arith.constant 2 : index
    %241 = memref.load %arg13[%c2_95] : memref<4xf32, #tpu.memory_space<smem>>
    %242 = vector.broadcast %240 : f32 to vector<8x1xf32>
    %243 = arith.mulf %242, %45 : vector<8x1xf32>
    %244 = vector.broadcast %241 : f32 to vector<8x1xf32>
    %245 = arith.mulf %244, %47 : vector<8x1xf32>
    %246 = arith.addf %243, %245 : vector<8x1xf32>
    %cst_96 = arith.constant 1.250000e-01 : f32
    %247 = vector.broadcast %cst_96 : f32 to vector<8x1xf32>
    %248 = arith.mulf %246, %247 : vector<8x1xf32>
    %249 = arith.mulf %240, %240 : f32
    %250 = vector.broadcast %249 : f32 to vector<8x1xf32>
    %251 = arith.mulf %250, %50 : vector<8x1xf32>
    %252 = arith.mulf %241, %241 : f32
    %253 = vector.broadcast %252 : f32 to vector<8x1xf32>
    %254 = arith.mulf %253, %53 : vector<8x1xf32>
    %255 = arith.addf %251, %254 : vector<8x1xf32>
    %cst_97 = arith.constant 8.000000e+00 : f32
    %256 = vector.broadcast %cst_97 : f32 to vector<8x1xf32>
    %257 = arith.mulf %256, %248 : vector<8x1xf32>
    %258 = arith.mulf %257, %248 : vector<8x1xf32>
    %259 = arith.subf %255, %258 : vector<8x1xf32>
    %cst_98 = arith.constant 0.000000e+00 : f32
    %260 = vector.broadcast %cst_98 : f32 to vector<8x1xf32>
    %261 = arith.maximumf %259, %260 : vector<8x1xf32>
    %cst_99 = arith.constant 0.142857149 : f32
    %262 = vector.broadcast %cst_99 : f32 to vector<8x1xf32>
    %263 = arith.mulf %261, %262 : vector<8x1xf32>
    %264 = math.sqrt %263 : vector<8x1xf32>
    %cst_100 = arith.constant 9.99999974E-6 : f32
    %265 = vector.broadcast %cst_100 : f32 to vector<8x1xf32>
    %266 = arith.addf %264, %265 : vector<8x1xf32>
    %267 = tpu.reciprocal %266 {approx = true} : vector<8x1xf32> -> vector<8x1xf32>
    %268 = vector.broadcast %3 : f32 to vector<8x1xf32>
    %269 = arith.mulf %268, %267 : vector<8x1xf32>
    %270 = vector.broadcast %240 : f32 to vector<8x1xf32>
    %271 = arith.mulf %270, %269 : vector<8x1xf32>
    %272 = vector.broadcast %271 : vector<8x1xf32> to vector<8x8xf32>
    %273 = arith.mulf %272, %41 : vector<8x8xf32>
    %274 = arith.addf %239, %273 : vector<8x8xf32>
    %275 = vector.broadcast %241 : f32 to vector<8x1xf32>
    %276 = arith.mulf %275, %269 : vector<8x1xf32>
    %277 = vector.broadcast %276 : vector<8x1xf32> to vector<8x8xf32>
    %278 = arith.mulf %277, %43 : vector<8x8xf32>
    %279 = arith.addf %274, %278 : vector<8x8xf32>
    %280 = arith.mulf %248, %269 : vector<8x1xf32>
    %281 = vector.broadcast %280 : vector<8x1xf32> to vector<8x8xf32>
    %282 = arith.subf %279, %281 : vector<8x8xf32>
    %cst_101 = arith.constant dense<0xFF800000> : vector<8xf32>
    %283 = vector.multi_reduction <maximumf>, %282, %cst_101 [1] : vector<8x8xf32> to vector<8xf32>
    %284 = vector.shape_cast %283 : vector<8xf32> to vector<8x1xf32>
    %285 = vector.broadcast %284 : vector<8x1xf32> to vector<8x8xf32>
    %286 = arith.subf %282, %285 : vector<8x8xf32>
    %287 = math.exp %286 : vector<8x8xf32>
    %cst_102 = arith.constant dense<0.000000e+00> : vector<8xf32>
    %288 = vector.multi_reduction <add>, %287, %cst_102 [1] : vector<8x8xf32> to vector<8xf32>
    %289 = vector.shape_cast %288 : vector<8xf32> to vector<8x1xf32>
    %290 = tpu.reciprocal %289 {approx = true} : vector<8x1xf32> -> vector<8x1xf32>
    %291 = vector.broadcast %290 : vector<8x1xf32> to vector<8x8xf32>
    %292 = arith.mulf %287, %291 : vector<8x8xf32>
    %293 = arith.truncf %292 : vector<8x8xf32> to vector<8x8xbf16>
    %c0_103 = arith.constant 0 : index
    %c16_104 = arith.constant 16 : index
    %294 = vector.load %arg25[%c0_103, %c16_104] : memref<8x32xbf16, #tpu.memory_space<vmem>>, vector<8x8xbf16>
    %cst_105 = arith.constant dense<0.000000e+00> : vector<8x8xf32>
    %295 = tpu.matmul %293, %294, %cst_105 {dimension_numbers = #tpu.dot_dimension_numbers<[1], [0], [0], [1], [0, 0, 1, 1], [], []>} : vector<8x8xbf16>, vector<8x8xbf16>, vector<8x8xf32> -> vector<8x8xf32>
    %c0_106 = arith.constant 0 : index
    %c16_107 = arith.constant 16 : index
    %296 = vector.load %arg26[%c0_106, %c16_107] : memref<8x32xf32, #tpu.memory_space<vmem>>, vector<8x8xf32>
    tpu.vector_store %arg26[%c0_106, %c16_107], %295 {strides = array<i32>} : memref<8x32xf32, #tpu.memory_space<vmem>>, vector<8x8xf32>,
    %c0_108 = arith.constant 0 : index
    %c24 = arith.constant 24 : index
    %297 = vector.load %arg23[%c0_108, %c24] : memref<8x32xbf16, #tpu.memory_space<vmem>>, vector<8x8xbf16>
    %c0_109 = arith.constant 0 : index
    %c24_110 = arith.constant 24 : index
    %298 = vector.load %arg24[%c0_109, %c24_110] : memref<8x32xbf16, #tpu.memory_space<vmem>>, vector<8x8xbf16>
    %cst_111 = arith.constant dense<0.000000e+00> : vector<8x8xf32>
    %299 = tpu.matmul %297, %298, %cst_111 {dimension_numbers = #tpu.dot_dimension_numbers<[1], [1], [0], [0], [0, 0, 1, 0], [], []>} : vector<8x8xbf16>, vector<8x8xbf16>, vector<8x8xf32> -> vector<8x8xf32>
    %cst_112 = arith.constant 0.353553385 : f32
    %300 = vector.broadcast %cst_112 : f32 to vector<8x8xf32>
    %301 = arith.mulf %299, %300 : vector<8x8xf32>
    %cst_113 = arith.constant dense<0.000000e+00> : vector<8xf32>
    %302 = vector.multi_reduction <add>, %301, %cst_113 [1] : vector<8x8xf32> to vector<8xf32>
    %303 = vector.shape_cast %302 : vector<8xf32> to vector<8x1xf32>
    %cst_114 = arith.constant 8.000000e+00 : f32
    %304 = vector.broadcast %cst_114 : f32 to vector<8x1xf32>
    %305 = arith.divf %303, %304 : vector<8x1xf32>
    %306 = vector.broadcast %305 : vector<8x1xf32> to vector<8x8xf32>
    %307 = arith.subf %301, %306 : vector<8x8xf32>
    %308 = arith.mulf %307, %307 : vector<8x8xf32>
    %cst_115 = arith.constant dense<0.000000e+00> : vector<8xf32>
    %309 = vector.multi_reduction <add>, %308, %cst_115 [1] : vector<8x8xf32> to vector<8xf32>
    %310 = vector.shape_cast %309 : vector<8xf32> to vector<8x1xf32>
    %cst_116 = arith.constant 0.142857149 : f32
    %311 = vector.broadcast %cst_116 : f32 to vector<8x1xf32>
    %312 = arith.mulf %310, %311 : vector<8x1xf32>
    %313 = math.sqrt %312 : vector<8x1xf32>
    %cst_117 = arith.constant 9.99999974E-6 : f32
    %314 = vector.broadcast %cst_117 : f32 to vector<8x1xf32>
    %315 = arith.addf %313, %314 : vector<8x1xf32>
    %316 = tpu.reciprocal %315 {approx = true} : vector<8x1xf32> -> vector<8x1xf32>
    %317 = vector.broadcast %316 : vector<8x1xf32> to vector<8x8xf32>
    %318 = arith.mulf %307, %317 : vector<8x8xf32>
    %319 = vector.broadcast %2 : f32 to vector<8x8xf32>
    %320 = arith.mulf %319, %318 : vector<8x8xf32>
    %c3 = arith.constant 3 : index
    %321 = memref.load %arg12[%c3] : memref<4xf32, #tpu.memory_space<smem>>
    %c3_118 = arith.constant 3 : index
    %322 = memref.load %arg13[%c3_118] : memref<4xf32, #tpu.memory_space<smem>>
    %323 = vector.broadcast %321 : f32 to vector<8x1xf32>
    %324 = arith.mulf %323, %45 : vector<8x1xf32>
    %325 = vector.broadcast %322 : f32 to vector<8x1xf32>
    %326 = arith.mulf %325, %47 : vector<8x1xf32>
    %327 = arith.addf %324, %326 : vector<8x1xf32>
    %cst_119 = arith.constant 1.250000e-01 : f32
    %328 = vector.broadcast %cst_119 : f32 to vector<8x1xf32>
    %329 = arith.mulf %327, %328 : vector<8x1xf32>
    %330 = arith.mulf %321, %321 : f32
    %331 = vector.broadcast %330 : f32 to vector<8x1xf32>
    %332 = arith.mulf %331, %50 : vector<8x1xf32>
    %333 = arith.mulf %322, %322 : f32
    %334 = vector.broadcast %333 : f32 to vector<8x1xf32>
    %335 = arith.mulf %334, %53 : vector<8x1xf32>
    %336 = arith.addf %332, %335 : vector<8x1xf32>
    %cst_120 = arith.constant 8.000000e+00 : f32
    %337 = vector.broadcast %cst_120 : f32 to vector<8x1xf32>
    %338 = arith.mulf %337, %329 : vector<8x1xf32>
    %339 = arith.mulf %338, %329 : vector<8x1xf32>
    %340 = arith.subf %336, %339 : vector<8x1xf32>
    %cst_121 = arith.constant 0.000000e+00 : f32
    %341 = vector.broadcast %cst_121 : f32 to vector<8x1xf32>
    %342 = arith.maximumf %340, %341 : vector<8x1xf32>
    %cst_122 = arith.constant 0.142857149 : f32
    %343 = vector.broadcast %cst_122 : f32 to vector<8x1xf32>
    %344 = arith.mulf %342, %343 : vector<8x1xf32>
    %345 = math.sqrt %344 : vector<8x1xf32>
    %cst_123 = arith.constant 9.99999974E-6 : f32
    %346 = vector.broadcast %cst_123 : f32 to vector<8x1xf32>
    %347 = arith.addf %345, %346 : vector<8x1xf32>
    %348 = tpu.reciprocal %347 {approx = true} : vector<8x1xf32> -> vector<8x1xf32>
    %349 = vector.broadcast %3 : f32 to vector<8x1xf32>
    %350 = arith.mulf %349, %348 : vector<8x1xf32>
    %351 = vector.broadcast %321 : f32 to vector<8x1xf32>
    %352 = arith.mulf %351, %350 : vector<8x1xf32>
    %353 = vector.broadcast %352 : vector<8x1xf32> to vector<8x8xf32>
    %354 = arith.mulf %353, %41 : vector<8x8xf32>
    %355 = arith.addf %320, %354 : vector<8x8xf32>
    %356 = vector.broadcast %322 : f32 to vector<8x1xf32>
    %357 = arith.mulf %356, %350 : vector<8x1xf32>
    %358 = vector.broadcast %357 : vector<8x1xf32> to vector<8x8xf32>
    %359 = arith.mulf %358, %43 : vector<8x8xf32>
    %360 = arith.addf %355, %359 : vector<8x8xf32>
    %361 = arith.mulf %329, %350 : vector<8x1xf32>
    %362 = vector.broadcast %361 : vector<8x1xf32> to vector<8x8xf32>
    %363 = arith.subf %360, %362 : vector<8x8xf32>
    %cst_124 = arith.constant dense<0xFF800000> : vector<8xf32>
    %364 = vector.multi_reduction <maximumf>, %363, %cst_124 [1] : vector<8x8xf32> to vector<8xf32>
    %365 = vector.shape_cast %364 : vector<8xf32> to vector<8x1xf32>
    %366 = vector.broadcast %365 : vector<8x1xf32> to vector<8x8xf32>
    %367 = arith.subf %363, %366 : vector<8x8xf32>
    %368 = math.exp %367 : vector<8x8xf32>
    %cst_125 = arith.constant dense<0.000000e+00> : vector<8xf32>
    %369 = vector.multi_reduction <add>, %368, %cst_125 [1] : vector<8x8xf32> to vector<8xf32>
    %370 = vector.shape_cast %369 : vector<8xf32> to vector<8x1xf32>
    %371 = tpu.reciprocal %370 {approx = true} : vector<8x1xf32> -> vector<8x1xf32>
    %372 = vector.broadcast %371 : vector<8x1xf32> to vector<8x8xf32>
    %373 = arith.mulf %368, %372 : vector<8x8xf32>
    %374 = arith.truncf %373 : vector<8x8xf32> to vector<8x8xbf16>
    %c0_126 = arith.constant 0 : index
    %c24_127 = arith.constant 24 : index
    %375 = vector.load %arg25[%c0_126, %c24_127] : memref<8x32xbf16, #tpu.memory_space<vmem>>, vector<8x8xbf16>
    %cst_128 = arith.constant dense<0.000000e+00> : vector<8x8xf32>
    %376 = tpu.matmul %374, %375, %cst_128 {dimension_numbers = #tpu.dot_dimension_numbers<[1], [0], [0], [1], [0, 0, 1, 1], [], []>} : vector<8x8xbf16>, vector<8x8xbf16>, vector<8x8xf32> -> vector<8x8xf32>
    %c0_129 = arith.constant 0 : index
    %c24_130 = arith.constant 24 : index
    %377 = vector.load %arg26[%c0_129, %c24_130] : memref<8x32xf32, #tpu.memory_space<vmem>>, vector<8x8xf32>
    tpu.vector_store %arg26[%c0_129, %c24_130], %376 {strides = array<i32>} : memref<8x32xf32, #tpu.memory_space<vmem>>, vector<8x8xf32>,
    %c0_131 = arith.constant 0 : index
    %c0_132 = arith.constant 0 : index
    %378 = vector.load %arg26[%c0_131, %c0_132] : memref<8x32xf32, #tpu.memory_space<vmem>>, vector<8x32xf32>
    %379 = arith.truncf %378 : vector<8x32xf32> to vector<8x32xbf16>
    %c0_133 = arith.constant 0 : index
    %c0_134 = arith.constant 0 : index
    %380 = vector.load %arg5[%c0_133, %c0_134] : memref<32x32xbf16, #tpu.memory_space<vmem>>, vector<32x32xbf16>
    %cst_135 = arith.constant dense<0.000000e+00> : vector<8x32xf32>
    %381 = tpu.matmul %379, %380, %cst_135 {dimension_numbers = #tpu.dot_dimension_numbers<[1], [0], [0], [1], [0, 0, 1, 1], [], []>} : vector<8x32xbf16>, vector<32x32xbf16>, vector<8x32xf32> -> vector<8x32xf32>
    %c0_136 = arith.constant 0 : index
    %c0_137 = arith.constant 0 : index
    %382 = vector.load %arg9[%c0_136, %c0_137] : memref<1x32xf32, #tpu.memory_space<vmem>>, vector<1x32xf32>
    %383 = vector.broadcast %382 : vector<1x32xf32> to vector<8x32xf32>
    %384 = arith.addf %381, %383 : vector<8x32xf32>
    %385 = arith.addf %1, %384 : vector<8x32xf32>
    %c0_138 = arith.constant 0 : index
    %c0_139 = arith.constant 0 : index
    %c0_140 = arith.constant 0 : index
    %386 = vector.load %arg10[%c0_138, %c0_139, %c0_140] : memref<1x8x1xf32, #tpu.memory_space<vmem>>, vector<1x8x1xf32>
    %387 = vector.shape_cast %386 : vector<1x8x1xf32> to vector<8x1xf32>
    %c0_141 = arith.constant 0 : index
    %c0_142 = arith.constant 0 : index
    %388 = vector.load %arg16[%c0_141, %c0_142] : memref<1x32xf32, #tpu.memory_space<vmem>>, vector<1x32xf32>
    %389 = vector.broadcast %387 : vector<8x1xf32> to vector<8x32xf32>
    %390 = vector.broadcast %388 : vector<1x32xf32> to vector<8x32xf32>
    %391 = arith.mulf %389, %390 : vector<8x32xf32>
    %c0_143 = arith.constant 0 : index
    %c0_144 = arith.constant 0 : index
    %392 = vector.load %arg17[%c0_143, %c0_144] : memref<1x32xf32, #tpu.memory_space<vmem>>, vector<1x32xf32>
    %393 = vector.broadcast %392 : vector<1x32xf32> to vector<8x32xf32>
    %394 = arith.addf %391, %393 : vector<8x32xf32>
    %cst_145 = arith.constant 0.000000e+00 : f32
    %395 = vector.broadcast %cst_145 : f32 to vector<8x32xf32>
    %396 = arith.maximumf %394, %395 : vector<8x32xf32>
    %397 = arith.truncf %396 : vector<8x32xf32> to vector<8x32xbf16>
    %c0_146 = arith.constant 0 : index
    %c0_147 = arith.constant 0 : index
    %398 = vector.load %arg18[%c0_146, %c0_147] : memref<32x32xbf16, #tpu.memory_space<vmem>>, vector<32x32xbf16>
    %cst_148 = arith.constant dense<0.000000e+00> : vector<8x32xf32>
    %399 = tpu.matmul %397, %398, %cst_148 {dimension_numbers = #tpu.dot_dimension_numbers<[1], [0], [0], [1], [0, 0, 1, 1], [], []>} : vector<8x32xbf16>, vector<32x32xbf16>, vector<8x32xf32> -> vector<8x32xf32>
    %c0_149 = arith.constant 0 : index
    %c0_150 = arith.constant 0 : index
    %400 = vector.load %arg19[%c0_149, %c0_150] : memref<1x32xf32, #tpu.memory_space<vmem>>, vector<1x32xf32>
    %401 = vector.broadcast %400 : vector<1x32xf32> to vector<8x32xf32>
    %402 = arith.addf %399, %401 : vector<8x32xf32>
    %403 = arith.addf %385, %402 : vector<8x32xf32>
    %cst_151 = arith.constant dense<0.000000e+00> : vector<8xf32>
    %404 = vector.multi_reduction <add>, %403, %cst_151 [1] : vector<8x32xf32> to vector<8xf32>
    %405 = vector.shape_cast %404 : vector<8xf32> to vector<8x1xf32>
    %cst_152 = arith.constant 3.200000e+01 : f32
    %406 = vector.broadcast %cst_152 : f32 to vector<8x1xf32>
    %407 = arith.divf %405, %406 : vector<8x1xf32>
    %408 = vector.broadcast %407 : vector<8x1xf32> to vector<8x32xf32>
    %409 = arith.subf %403, %408 : vector<8x32xf32>
    %410 = arith.mulf %409, %409 : vector<8x32xf32>
    %cst_153 = arith.constant dense<0.000000e+00> : vector<8xf32>
    %411 = vector.multi_reduction <add>, %410, %cst_153 [1] : vector<8x32xf32> to vector<8xf32>
    %412 = vector.shape_cast %411 : vector<8xf32> to vector<8x1xf32>
    %cst_154 = arith.constant 3.200000e+01 : f32
    %413 = vector.broadcast %cst_154 : f32 to vector<8x1xf32>
    %414 = arith.divf %412, %413 : vector<8x1xf32>
    %cst_155 = arith.constant 9.99999974E-6 : f32
    %415 = vector.broadcast %cst_155 : f32 to vector<8x1xf32>
    %416 = arith.addf %414, %415 : vector<8x1xf32>
    %417 = math.rsqrt %416 : vector<8x1xf32>
    %418 = vector.broadcast %417 : vector<8x1xf32> to vector<8x32xf32>
    %419 = arith.mulf %409, %418 : vector<8x32xf32>
    %c0_156 = arith.constant 0 : index
    %c0_157 = arith.constant 0 : index
    %420 = vector.load %arg20[%c0_156, %c0_157] : memref<1x32xf32, #tpu.memory_space<vmem>>, vector<1x32xf32>
    %421 = vector.broadcast %420 : vector<1x32xf32> to vector<8x32xf32>
    %422 = arith.mulf %419, %421 : vector<8x32xf32>
    %c0_158 = arith.constant 0 : index
    %c0_159 = arith.constant 0 : index
    %423 = vector.load %arg21[%c0_158, %c0_159] : memref<1x32xf32, #tpu.memory_space<vmem>>, vector<1x32xf32>
    %424 = vector.broadcast %423 : vector<1x32xf32> to vector<8x32xf32>
    %425 = arith.addf %422, %424 : vector<8x32xf32>
    %c0_160 = arith.constant 0 : index
    %c0_161 = arith.constant 0 : index
    %c0_162 = arith.constant 0 : index
    %426 = vector.load %arg22[%c0_160, %c0_161, %c0_162] : memref<1x8x32xf32, #tpu.memory_space<vmem>>, vector<1x8x32xf32>
    %427 = vector.shape_cast %426 : vector<1x8x32xf32> to vector<8x32xf32>
    %428 = vector.shape_cast %425 : vector<8x32xf32> to vector<1x8x32xf32>
    tpu.vector_store %arg22[%c0_160, %c0_161, %c0_162], %428 {strides = array<i32>} : memref<1x8x32xf32, #tpu.memory_space<vmem>>, vector<1x8x32xf32>,
    return
  }
  func.func @transform_0(%arg0: i32) -> (i32, i32, i32) {
    %c0_i32 = arith.constant 0 : i32
    %c0_i32_0 = arith.constant 0 : i32
    %c0_i32_1 = arith.constant 0 : i32
    return %arg0, %c0_i32, %c0_i32_0 : i32, i32, i32
  }
  func.func @transform_1(%arg0: i32) -> (i32, i32) {
    %c0_i32 = arith.constant 0 : i32
    %c0_i32_0 = arith.constant 0 : i32
    %c0_i32_1 = arith.constant 0 : i32
    return %c0_i32, %c0_i32_0 : i32, i32
  }
  func.func @transform_2(%arg0: i32) -> (i32, i32) {
    %c0_i32 = arith.constant 0 : i32
    %c0_i32_0 = arith.constant 0 : i32
    %c0_i32_1 = arith.constant 0 : i32
    return %c0_i32, %c0_i32_0 : i32, i32
  }
  func.func @transform_3(%arg0: i32) -> (i32, i32) {
    %c0_i32 = arith.constant 0 : i32
    %c0_i32_0 = arith.constant 0 : i32
    %c0_i32_1 = arith.constant 0 : i32
    return %c0_i32, %c0_i32_0 : i32, i32
  }
  func.func @transform_4(%arg0: i32) -> (i32, i32) {
    %c0_i32 = arith.constant 0 : i32
    %c0_i32_0 = arith.constant 0 : i32
    %c0_i32_1 = arith.constant 0 : i32
    return %c0_i32, %c0_i32_0 : i32, i32
  }
  func.func @transform_5(%arg0: i32) -> (i32, i32) {
    %c0_i32 = arith.constant 0 : i32
    %c0_i32_0 = arith.constant 0 : i32
    %c0_i32_1 = arith.constant 0 : i32
    return %c0_i32, %c0_i32_0 : i32, i32
  }
  func.func @transform_6(%arg0: i32) -> (i32, i32) {
    %c0_i32 = arith.constant 0 : i32
    %c0_i32_0 = arith.constant 0 : i32
    %c0_i32_1 = arith.constant 0 : i32
    return %c0_i32, %c0_i32_0 : i32, i32
  }
  func.func @transform_7(%arg0: i32) -> (i32, i32) {
    %c0_i32 = arith.constant 0 : i32
    %c0_i32_0 = arith.constant 0 : i32
    %c0_i32_1 = arith.constant 0 : i32
    return %c0_i32, %c0_i32_0 : i32, i32
  }
  func.func @transform_8(%arg0: i32) -> (i32, i32) {
    %c0_i32 = arith.constant 0 : i32
    %c0_i32_0 = arith.constant 0 : i32
    %c0_i32_1 = arith.constant 0 : i32
    return %c0_i32, %c0_i32_0 : i32, i32
  }
  func.func @transform_9(%arg0: i32) -> (i32, i32, i32) {
    %c0_i32 = arith.constant 0 : i32
    %c0_i32_0 = arith.constant 0 : i32
    %c0_i32_1 = arith.constant 0 : i32
    return %arg0, %c0_i32, %c0_i32_0 : i32, i32, i32
  }
  func.func @transform_10(%arg0: i32) -> (i32, i32, i32) {
    %c0_i32 = arith.constant 0 : i32
    %c0_i32_0 = arith.constant 0 : i32
    %c0_i32_1 = arith.constant 0 : i32
    return %arg0, %c0_i32, %c0_i32_0 : i32, i32, i32
  }
  func.func @transform_11(%arg0: i32) -> i32 {
    %c0_i32 = arith.constant 0 : i32
    %c0_i32_0 = arith.constant 0 : i32
    return %c0_i32 : i32
  }
  func.func @transform_12(%arg0: i32) -> i32 {
    %c0_i32 = arith.constant 0 : i32
    %c0_i32_0 = arith.constant 0 : i32
    return %c0_i32 : i32
  }
  func.func @transform_13(%arg0: i32) -> i32 {
    %c0_i32 = arith.constant 0 : i32
    %c0_i32_0 = arith.constant 0 : i32
    return %c0_i32 : i32
  }
  func.func @transform_14(%arg0: i32) -> i32 {
    %c0_i32 = arith.constant 0 : i32
    %c0_i32_0 = arith.constant 0 : i32
    return %c0_i32 : i32
  }
  func.func @transform_15(%arg0: i32) -> (i32, i32) {
    %c0_i32 = arith.constant 0 : i32
    %c0_i32_0 = arith.constant 0 : i32
    %c0_i32_1 = arith.constant 0 : i32
    return %c0_i32, %c0_i32_0 : i32, i32
  }
  func.func @transform_16(%arg0: i32) -> (i32, i32) {
    %c0_i32 = arith.constant 0 : i32
    %c0_i32_0 = arith.constant 0 : i32
    %c0_i32_1 = arith.constant 0 : i32
    return %c0_i32, %c0_i32_0 : i32, i32
  }
  func.func @transform_17(%arg0: i32) -> (i32, i32) {
    %c0_i32 = arith.constant 0 : i32
    %c0_i32_0 = arith.constant 0 : i32
    %c0_i32_1 = arith.constant 0 : i32
    return %c0_i32, %c0_i32_0 : i32, i32
  }
  func.func @transform_18(%arg0: i32) -> (i32, i32) {
    %c0_i32 = arith.constant 0 : i32
    %c0_i32_0 = arith.constant 0 : i32
    %c0_i32_1 = arith.constant 0 : i32
    return %c0_i32, %c0_i32_0 : i32, i32
  }
  func.func @transform_19(%arg0: i32) -> (i32, i32) {
    %c0_i32 = arith.constant 0 : i32
    %c0_i32_0 = arith.constant 0 : i32
    %c0_i32_1 = arith.constant 0 : i32
    return %c0_i32, %c0_i32_0 : i32, i32
  }
  func.func @transform_20(%arg0: i32) -> (i32, i32) {
    %c0_i32 = arith.constant 0 : i32
    %c0_i32_0 = arith.constant 0 : i32
    %c0_i32_1 = arith.constant 0 : i32
    return %c0_i32, %c0_i32_0 : i32, i32
  }
  func.func @transform_21(%arg0: i32) -> (i32, i32, i32) {
    %c0_i32 = arith.constant 0 : i32
    %c0_i32_0 = arith.constant 0 : i32
    %c0_i32_1 = arith.constant 0 : i32
    return %arg0, %c0_i32, %c0_i32_0 : i32, i32, i32
  }
}

</mosaic_0001>

<bundles_post_ra>
// kernel: tpu_custom_call.1
= control target key start
LH: loop header
LB: loop body
LE: loop exit
PB: predicated region body
PF: predicated region fallthrough
CT: control target
= control target key end

     0   :  { %s3371_s0 = inlined_call_operand.vmem [shape: f32[2,8,32], index: 0, kind: input, shape index: {}]   ;;  %s3372_s1 = inlined_call_operand.hbm [shape: bf16[32,32], index: 1, kind: input, shape index: {}]   ;;  %s3373_s2 = inlined_call_operand.hbm [shape: bf16[32,32], index: 2, kind: input, shape index: {}]   ;;  %s3374_s3 = inlined_call_operand.hbm [shape: bf16[32,32], index: 3, kind: input, shape index: {}]   ;;  %s3375_s4 = inlined_call_operand.hbm [shape: bf16[32,32], index: 4, kind: input, shape index: {}]   ;;  %s3376_s5 = inlined_call_operand.hbm [shape: f32[1,32], index: 5, kind: input, shape index: {}]   ;;  %s3377_s6 = inlined_call_operand.hbm [shape: f32[1,32], index: 6, kind: input, shape index: {}]   ;;  %s3378_s7 = inlined_call_operand.hbm [shape: f32[1,32], index: 7, kind: input, shape index: {}]   ;;  %s3379_s8 = inlined_call_operand.hbm [shape: f32[1,32], index: 8, kind: input, shape index: {}]   ;;  %s3380_s9 = inlined_call_operand.vmem [shape: f32[2,8,1], index: 9, kind: input, shape index: {}]   ;;  %s3381_s10 = inlined_call_operand.vmem [shape: f32[2,1,8], index: 10, kind: input, shape index: {}]   ;;  %s3382_s11 = inlined_call_operand.hbm [shape: f32[4], index: 11, kind: input, shape index: {}]   ;;  %s3383_s12 = inlined_call_operand.hbm [shape: f32[4], index: 12, kind: input, shape index: {}]   ;;  %s3384_s13 = inlined_call_operand.<no memory space> [shape: f32[1], index: 13, kind: input, shape index: {}]   ;;  %s3385_s14 = inlined_call_operand.<no memory space> [shape: f32[1], index: 14, kind: input, shape index: {}]   ;;  %s3386_s15 = inlined_call_operand.hbm [shape: f32[1,32], index: 15, kind: input, shape index: {}]   ;;  %s3387_s16 = inlined_call_operand.hbm [shape: f32[1,32], index: 16, kind: input, shape index: {}]   ;;  %s3388_s17 = inlined_call_operand.vmem [shape: bf16[32,32], index: 17, kind: input, shape index: {}]   ;;  %s3389_s18 = inlined_call_operand.vmem [shape: f32[1,32], index: 18, kind: input, shape index: {}]   ;;  %s3390_s19 = inlined_call_operand.vmem [shape: f32[1,32], index: 19, kind: input, shape index: {}]   ;;  %s3391_s20 = inlined_call_operand.vmem [shape: f32[1,32], index: 20, kind: input, shape index: {}]   ;;  %s3392_s21 = inlined_call_operand.hbm [shape: f32[2,8,32], index: 21, kind: output, shape index: {}]  }
   0x1   :  { %3406 = sst [smem:[#allocation47_spill]] %s3371_s0 }
   0x2   :  { %3407 = sst [smem:[#allocation48_spill]] %s3372_s1 }
   0x3   :  { %3408 = sst [smem:[#allocation49_spill]] %s3373_s2 }
   0x4   :  { %3409 = sst [smem:[#allocation50_spill]] %s3374_s3 }
   0x5   :  { %3410 = sst [smem:[#allocation51_spill]] %s3375_s4 }
   0x6   :  { %3411 = sst [smem:[#allocation52_spill]] %s3376_s5 }
   0x7   :  { %3412 = sst [smem:[#allocation53_spill]] %s3377_s6 }
   0x8   :  { %3413 = sst [smem:[#allocation54_spill]] %s3391_s20 }
   0x9   :  { %3414 = sst [smem:[#allocation55_spill]] %s3392_s21 }
   0xa   :  { %26 = sst [smem:[#allocation6]] %s3384_s13 }
   0xb   :  { %27 = sst [smem:[#allocation7]] %s3385_s14 }
   0xc   :  { %28 = vsyncpa [#allocation9], 0 }
   0xd   :  { %29 = vsyncpa [#allocation13], 0 }
   0xe   :  { %30 = vsyncpa [#allocation16], 0 }
   0xf   :  { %31 = vsyncpa [#allocation19], 0 }
  0x10   :  { %32 = vsyncpa [#allocation22], 0 }
  0x11   :  { %33 = vsyncpa [#allocation11], 0 }
  0x12   :  { %34 = vsyncpa [#allocation25], 0 }
  0x13   :  { %35 = vsyncpa [#allocation28], 0 }
  0x14   :  { %36 = vsyncpa [#allocation10], 0 }
  0x15   :  { %38 = vsyncpa [#allocation10 + $0x1], 0  ;;  %s2842_s3 = smov 0   ;;  %s2844_s28 = smov 0  }
  0x16   :  { %s2846_s29 = smov 0   ;;  %s2848_s13 = smov 0  }
  0x17 LB: > { %3415 = sst [smem:[#allocation40_spill]] %s2689_s3  ;;  %s2863_s14 = sadd.s32 4294967295, %s2701_s13   ;;  %s2701_s13 = sphi %s2848_s13, %s3442_s13   ;;  %s2697_s29 = sphi %s2846_s29, %s3444_s29   ;;  %s2693_s28 = sphi %s2844_s28, %s3446_s28   ;;  %s2689_s3 = sphi %s2842_s3, %s3445_s3  }
  0x18   : > { %3416 = sst [smem:[#allocation41_spill]] %s2697_s29  ;;  %s1929_s0 = sadd.s32 4294967294, %s2701_s13  }
  0x19   : > { %3417 = sst [smem:[#allocation42_spill]] %s2701_s13  ;;  %s2867_s4 = sadd.s32 1, %s2701_s13  }
  0x1a   : > { %3418 = sst [smem:[#allocation43_spill]] %s2867_s4  ;;  %s507_s30 = sadd.s32 1, %s2697_s29 }
  0x1b   : > { %s504_s5 = ssub.s32 %s2701_s13, %s2867_s4  ;;  %p517_p0 = scmp.ne.s32.totalorder %s2697_s29, %s2693_s28 }
  0x1c   : > { %p505_p1 = scmp.eq.s32.totalorder %s504_s5, 0  ;;  %p518_p2 = scmp.eq.s32.totalorder %s2863_s14, 1 }
  0x1d   : > { %p523_p3 = scmp.ne.s32.totalorder %s2693_s28, %s2689_s3  ;;  %p524_p4 = scmp.eq.s32.totalorder %s1929_s0, 1 }
  0x1e   : > { %s2878_s22 = scalar_select %p505_p1, %s2697_s29, %s507_s30  }
  0x1f   : > { %p2880_p5 = por %p518_p2, %p517_p0  ;;  %p2884_p6 = por %p524_p4, %p523_p3 }
  0x20   : > { %3419 = sst [smem:[#allocation44_spill]] %s2878_s22  ;;  %p1930_p7 = scmp.ge.s32.totalorder %s2701_s13, 1 }
  0x21   : > { %s3420_s23 = scalar_select %p2880_p5, 1, 0 }
  0x22   : > { %s3422_s1 = scalar_select %p2884_p6, 1, 0 }
  0x23   : > { %3421 = sst [smem:[#allocation45_spill]] %s3420_s23  ;;  %p531_p8 = scmp.lt.s32.totalorder %s2701_s13, 3 }
  0x24   : > { %3423 = sst [smem:[#allocation46_spill]] %s3422_s1  ;;  %p2124_p9 = scmp.eq.s32.totalorder %s2863_s14, 0 }
  0x25   : > { %p2891_p10 = pnand %p1930_p7, %p531_p8  ;;  %s3425_s26 = sld [smem:[#allocation49_spill]] }
  0x26   : > { %s3426_s5 = sld [smem:[#allocation51_spill]]  ;;  %s2703_s4 = smov [#allocation12]  }
  0x27   : > { %p2083_p11 = pneg %p2891_p10  ;;  %s558_s1 = sshll.u32 %s2703_s4, 4  ;;  %s559_s1 = int_to_ptr.vmem [resolvable:$true] %s558_s1 }
  0x28   : > { %s3402_s2 = smov 64   ;;  %s2705_s25 = smov 4  }
  0x29   : > { %p2905_p12 = pnand %p2124_p9, %p2083_p11  ;;  %s3428_s6 = sld [smem:[#allocation53_spill]] }
  0x2a   : > { %s635_s20 = sshll.u32 %s3379_s8, 4  ;;  %s2707_s23 = smov [#allocation18]   ;;  %s636_s20 = int_to_ptr.hbm [resolvable:$true] %s635_s20 }
  0x2b   : > { %s556_s27 = sshll.u32 %s3425_s26, 4  ;;  %s2706_s26 = smov [#allocation15]   ;;  %s557_s27 = int_to_ptr.hbm [resolvable:$true] %s556_s27 }
  0x2c   : > { %s584_s22 = sshll.u32 %s3426_s5, 4  ;;  %s586_s0 = sshll.u32 %s2706_s26, 4  ;;  %s585_s22 = int_to_ptr.hbm [resolvable:$true] %s584_s22  ;;  %s587_s0 = int_to_ptr.vmem [resolvable:$true] %s586_s0 }
  0x2d   : > { %2089 = dma.hbm_to_vmem [thread:$0]  (!%p2905_p12), %s557_s27, 256, %s559_s1, [#allocation13], %s3402_s2, %s3402_s2, %s2705_s25  }
  0x2e   : > { %2095 = dma.hbm_to_vmem [thread:$0]  (!%p2905_p12), %s585_s22, 256, %s587_s0, [#allocation16], %s3402_s2, %s3402_s2, %s2705_s25  }
  0x2f   : > { %s611_s3 = sshll.u32 %s3428_s6, 4  ;;  %s613_s1 = sshll.u32 %s2707_s23, 4  ;;  %s612_s3 = int_to_ptr.hbm [resolvable:$true] %s611_s3  ;;  %s614_s1 = int_to_ptr.vmem [resolvable:$true] %s613_s1 }
  0x30   : > { %2101 = dma.hbm_to_vmem [thread:$0]  (!%p2905_p12), %s612_s3, 16, %s614_s1, [#allocation19]  }
  0x31   : > { %s2708_s27 = smov [#allocation21]   ;;  %s3429_s6 = sld [smem:[#allocation48_spill]] }
  0x32   : > { %s637_s26 = sshll.u32 %s2708_s27, 4  ;;  %s3430_s0 = sld [smem:[#allocation50_spill]]  ;;  %s638_s26 = int_to_ptr.vmem [resolvable:$true] %s637_s26 }
  0x33   : > { %2107 = dma.hbm_to_vmem [thread:$0]  (!%p2905_p12), %s636_s20, 16, %s638_s26, [#allocation22]  }
  0x34   : > { %s2709_s23 = smov [#allocation8]   ;;  %s3431_s3 = smov 64  }
  0x35   : > { %s544_s2 = sshll.u32 %s2709_s23, 4  ;;  %s2710_s1 = smov [#allocation14]   ;;  %s545_s2 = int_to_ptr.vmem [resolvable:$true] %s544_s2 }
  0x36   : > { %s3432_s5 = sld [smem:[#allocation52_spill]]  ;;  %s623_s22 = sshll.u32 %s3378_s7, 4  ;;  %s624_s22 = int_to_ptr.hbm [resolvable:$true] %s623_s22 }
  0x37   : > { %s542_s21 = sshll.u32 %s3429_s6, 4  ;;  %s572_s6 = sshll.u32 %s2710_s1, 4  ;;  %s543_s21 = int_to_ptr.hbm [resolvable:$true] %s542_s21  ;;  %s573_s6 = int_to_ptr.vmem [resolvable:$true] %s572_s6 }
  0x38   : > { %s570_s4 = sshll.u32 %s3430_s0, 4  ;;  %s2712_s0 = smov [#allocation20]   ;;  %s571_s4 = int_to_ptr.hbm [resolvable:$true] %s570_s4 }
  0x39   : > { %2086 = dma.hbm_to_vmem [thread:$0]  (!%p2905_p12), %s543_s21, 256, %s545_s2, [#allocation9], %s3431_s3, %s3431_s3, %s2705_s25  }
  0x3a   : > { %2092 = dma.hbm_to_vmem [thread:$0]  (!%p2905_p12), %s571_s4, 256, %s573_s6, [#allocation13], %s3431_s3, %s3431_s3, %s2705_s25  }
  0x3b   : > { %s2711_s21 = smov [#allocation17]   ;;  %s625_s23 = sshll.u32 %s2712_s0, 4  ;;  %s626_s23 = int_to_ptr.vmem [resolvable:$true] %s625_s23 }
  0x3c   : > { %s599_s20 = sshll.u32 %s3432_s5, 4  ;;  %s601_s2 = sshll.u32 %s2711_s21, 4  ;;  %s600_s20 = int_to_ptr.hbm [resolvable:$true] %s599_s20  ;;  %s602_s2 = int_to_ptr.vmem [resolvable:$true] %s601_s2 }
  0x3d   : > { %2098 = dma.hbm_to_vmem [thread:$0]  (!%p2905_p12), %s600_s20, 16, %s602_s2, [#allocation16]  }
  0x3e   : > { %s647_s30 = sshll.u32 %s3382_s11, 4  ;;  %s657_s3 = sshll.u32 %s3383_s12, 4  ;;  %s648_s30 = int_to_ptr.hbm [resolvable:$true] %s647_s30  ;;  %s658_s3 = int_to_ptr.hbm [resolvable:$true] %s657_s3 }
  0x3f   : > { %2104 = dma.hbm_to_vmem [thread:$0]  (!%p2905_p12), %s624_s22, 16, %s626_s23, [#allocation19]  }
  0x40   : > { %s2713_s6 = smov [#allocation23]   ;;  %s2714_s5 = smov [#allocation24]  }
  0x41   : > { %2110 = dma.hbm_to_smem (!%p2905_p12), %s648_s30, 16, %s2713_s6, [#allocation11]  }
  0x42   : > { %2113 = dma.hbm_to_smem (!%p2905_p12), %s658_s3, 16, %s2714_s5, [#allocation25]  }
  0x43   : > { %s673_s13 = sshll.u32 %s3386_s15, 4  ;;  %s2715_s21 = smov [#allocation26]   ;;  %s674_s13 = int_to_ptr.hbm [resolvable:$true] %s673_s13 }
  0x44   : > { %s675_s2 = sshll.u32 %s2715_s21, 4  ;;  %s685_s23 = sshll.u32 %s3387_s16, 4  ;;  %s676_s2 = int_to_ptr.vmem [resolvable:$true] %s675_s2  ;;  %s686_s23 = int_to_ptr.hbm [resolvable:$true] %s685_s23 }
  0x45   : > { %2116 = dma.hbm_to_vmem [thread:$0]  (!%p2905_p12), %s674_s13, 16, %s676_s2, [#allocation22]  }
  0x46   : > { %s2716_s1 = smov [#allocation27]   ;;  %732 = sbr.rel (%p2891_p10) target bundleno = 1722 (0x6ba), region = 104 }
  0x47   : > { %s687_s27 = sshll.u32 %s2716_s1, 4  ;;  %s688_s27 = int_to_ptr.vmem [resolvable:$true] %s687_s27 }
  0x48   : > { %2119 = dma.hbm_to_vmem [thread:$0]  (!%p2905_p12), %s686_s23, 16, %s688_s27, [#allocation28]  }
  0x4b   : > { %2648 = dma.done.wait (%p2124_p9), [#allocation9], 256  }
  0x4c   : > { %2650 = vsyncadd (%p2124_p9), [#allocation9], 4294967040 }
  0x4d   : > { %2652 = dma.done.wait (%p2124_p9), [#allocation13], 512  }
  0x4e   : > { %2654 = vsyncadd (%p2124_p9), [#allocation13], 4294966784 }
  0x4f   : > { %2656 = dma.done.wait (%p2124_p9), [#allocation16], 272  }
  0x50   : > { %2658 = vsyncadd (%p2124_p9), [#allocation16], 4294967024 }
  0x51   : > { %2660 = dma.done.wait (%p2124_p9), [#allocation19], 32  }
  0x52   : > { %2662 = vsyncadd (%p2124_p9), [#allocation19], 4294967264 }
  0x53   : > { %2664 = dma.done.wait (%p2124_p9), [#allocation22], 16  }
  0x54   : > { %2666 = vsyncadd (%p2124_p9), [#allocation22], 4294967280 }
  0x55   : > { %2668 = dma.done.wait (%p2124_p9), [#allocation11], 16  }
  0x56   : > { %2670 = vsyncadd (%p2124_p9), [#allocation11], 4294967280 }
  0x57   : > { %2672 = dma.done.wait (%p2124_p9), [#allocation25], 16  }
  0x58   : > { %2674 = vsyncadd (%p2124_p9), [#allocation25], 4294967280 }
  0x59   : > { %2676 = dma.done.wait (%p2124_p9), [#allocation22], 16  }
  0x5a   : > { %2678 = vsyncadd (%p2124_p9), [#allocation22], 4294967280 }
  0x5b   : > { %2680 = dma.done.wait (%p2124_p9), [#allocation28], 16  }
  0x5c   : > { %2682 = vsyncadd (%p2124_p9), [#allocation28], 4294967280 }
  0x5d   : > { %794 = sfence }
  0x5e   : > { %v2024_v0 = vld [vmem:[#allocation8 + $0x8] sm:$0xff]  ;;  %v2026_v1 = vld [vmem:[#allocation12 + $0x8] sm:$0xff]  ;;  %p855_p13 = scmp.lt.s32.totalorder %s2863_s14, 1  ;;  %v2023_v2 = vld [vmem:[#allocation8] sm:$0xff]  ;;  %s3433_s4 = sld [smem:[#allocation47_spill]]  ;;  %vm891_vm0 = vcmask 261120  }
  0x5f   : > { %901 = vmatpush.bf16.msra.mxu0 %v2024_v0  ;;  %937 = vmatpush.bf16.msra.mxu1 %v2026_v1  ;;  %v2025_v3 = vld [vmem:[#allocation12] sm:$0xff]  ;;  %v2206_v6 = vld [vmem:[#allocation17] ss:$0 sm:$0xff]  ;;  %v2207_v7 = vld [vmem:[#allocation18] ss:$0 sm:$0xff]  ;;  %vm909_vm1 = vcmask 257024  }
  0x60   : > { %s3015_s29 = scalar_select %p855_p13, %s2863_s14, 1  ;;  %vm998_vm2 = vcmask 64512   ;;  %v2720_v38 = vmov 0   ;;  %v2721_v55 = vmov 8.0  }
  0x61   : > { %s3405_s6 = smov 112   ;;  %s2718_s5 = smov 120   ;;  %2204 = vset.pattern.permute.xlu0 %v2720_v38  ;;  %2205 = vset.pattern.permute.xlu2 %v2720_v38  ;;  %2216 = vrcp.f32 %v2721_v55 }
  0x62   : > { %s1958_s24 = sshll.u32 %s3015_s29, 3  ;;  %s3404_s20 = smov 104  }
  0x63   : > { %902 = vmatpush.bf16.msra.mxu0 %v2023_v2  ;;  %938 = vmatpush.bf16.msra.mxu1 %v2025_v3  ;;  %s865_s21 = scalar_lea.vmem %s3381_s10, %s3015_s29  ;;  %s862_s0 = scalar_lea.vmem %s3380_s9, %s1958_s24 }
  0x64   : > { %s3023_s3 = scalar_lea.vmem %s3433_s4, %s1958_s24  ;;  %v3051_v37 = vld [vmem:[%s862_s0] sm:$0xff]  ;;  %s3089_s23 = sld [smem:[#allocation23]] }
  0x65   : > { %v867_v4 = vld [vmem:[%s3023_s3] sm:$0xff]  ;;  %s3091_s1 = sld [smem:[#allocation23 + $0x1]] }
  0x66   : > { %v3026_v5 = vpack.c.bf16 %v867_v4, %v867_v4  ;;  %v2208_v52 = vld [vmem:[%s865_s21] ss:$0 sm:$0xff]  ;;  %s3093_s27 = sld [smem:[#allocation23 + $0x2]] }
  0x67   : > { %v2217_v57 = vpop.eup %2216  ;;  %s3095_s29 = sld [smem:[#allocation23 + $0x3]] }
  0x68   : > { %1968 = vmatmul.msk.bf16.vlgmr.msra.gmra.mxu0 %vm891_vm0, %v3026_v5  ;;  %1977 = vmatmul.msk.bf16.vlgmr.msra.gmra.mxu1 %vm891_vm0, %v3026_v5  ;;  %v1039_v58 = vmul.f32 8.0, %v2217_v57  ;;  %vm1043_vm3 = vweird.f32 %v2217_v57  ;;  %s3098_s24 = sld [smem:[#allocation24]] }
  0x69   : > { %s3100_s30 = sld [smem:[#allocation24 + $0x1]] }
  0x6a   : > { %v1040_v62 = vsub.f32 1.0, %v1039_v58  ;;  %s3104_s25 = sld [smem:[#allocation24 + $0x2]]  ;;  %s1077_s26 = smul.f32 %s3089_s23, %s3089_s23  ;;  %v1071_v38 = vstv %s3089_s23 }
  0x6b   : > { %s3106_s4 = sld [smem:[#allocation24 + $0x3]]  ;;  %s1213_s13 = smul.f32 %s3091_s1, %s3091_s1 }
  0x6c   : > { %v1041_v2 = vmul.f32 %v2217_v57, %v1040_v62  ;;  %s1357_s21 = smul.f32 %s3093_s27, %s3093_s27  ;;  %s3435_s23 = smov 104  }
  0x6d   : > { %s1501_s2 = smul.f32 %s3095_s29, %s3095_s29  ;;  %v1214_v58 = vstv %s1213_s13 }
  0x6e   : > { %s1080_s22 = smul.f32 %s3098_s24, %s3098_s24 }
  0x6f   : > { %s1216_s0 = smul.f32 %s3100_s30, %s3100_s30 }
  0xe5   : > { %v904_v8 = vpop.f32.mrf.mxu0  ;;  %v940_v9 = vpop.f32.mrf.mxu1 }
  0xe6   : > { %v905_v10 = vadd.f32 %v2206_v6, %v904_v8  ;;  %v941_v11 = vadd.f32 %v2207_v7, %v940_v9  ;;  %v1042_v7 = vadd.f32 %v2217_v57, %v1041_v2  ;;  %v1502_v2 = vstv %s1501_s2  ;;  %s2020_s2 = sshll.u32 %s2863_s14, 3 }
  0xe8   : > { %v908_v12 = vpack.c.bf16 %v905_v10, %v905_v10  ;;  %v944_v13 = vpack.c.bf16 %v941_v11, %v941_v11 }
  0xea   : > { %910 = vst.msk [vmem:[#allocation2] sm:$0xf] %vm909_vm1, %v908_v12  ;;  %v3069_v12 = vsel %vm1043_vm3, %v2217_v57, %v1042_v7  ;;  %v1078_v57 = vstv %s1077_s26 }
  0xeb   : > { %945 = vst.msk [vmem:[#allocation3] sm:$0xf] %vm909_vm1, %v944_v13 }
  0xed   : > { %v906_v14 = vpop.f32.mrf.mxu0  ;;  %v942_v15 = vpop.f32.mrf.mxu1 }
  0xf1   : > { %v1291_v16 = vld [vmem:[#allocation2] sm:$0xf] }
  0xf2   : > { %v1014_v17 = vld [vmem:[#allocation3] sm:$0xf]  ;;  %v1294_v20 = vunpack.c.l.b16 %v1291_v16  ;;  %v1435_v24 = vld [vmem:[#allocation2] sm:$0xf] }
  0xf3   : > { %v1292_v18 = vld [vmem:[#allocation3] sm:$0xf]  ;;  %v1019_v21 = vsel %vm998_vm2, %v1014_v17, 0  ;;  %v1147_v26 = vld [vmem:[#allocation2] sm:$0xf]  ;;  %v1438_v30 = vunpack.c.l.b16 %v1435_v24 }
  0xf4   : > { %v1148_v19 = vld [vmem:[#allocation3] sm:$0xf]  ;;  %v1299_v22 = vunpack.c.l.b16 %v1292_v18  ;;  %1028 = vmatpush.bf16.xpose.msra.mxu3 %v1019_v21  ;;  %v1295_v25 = vpack.c.b16 %v1294_v20, %v1294_v20  ;;  %v1150_v31 = vunpack.c.l.b16 %v1147_v26  ;;  %v1013_v32 = vld [vmem:[#allocation2] sm:$0xf] }
  0xf5   : > { %v1155_v23 = vunpack.c.l.b16 %v1148_v19  ;;  %v1436_v29 = vld [vmem:[#allocation3] sm:$0xf]  ;;  %v1439_v34 = vpack.c.b16 %v1438_v30, %v1438_v30 }
  0xf6   : > { %v1300_v27 = vpack.c.b16 %v1299_v22, %v1299_v22  ;;  %1296 = vrot.lane.b32.xlu2 %v1295_v25, %s3405_s6  ;;  %v1443_v33 = vunpack.c.l.b16 %v1436_v29  ;;  %v1151_v35 = vpack.c.b16 %v1150_v31, %v1150_v31 }
  0xf7   : > { %v1156_v28 = vpack.c.b16 %v1155_v23, %v1155_v23 }
  0xf8   : > { %1301 = vrot.lane.b32.xlu1 %v1300_v27, %s3405_s6  ;;  %v1444_v36 = vpack.c.b16 %v1443_v33, %v1443_v33  ;;  %s1504_s6 = smul.f32 %s3106_s4, %s3106_s4 }
  0xf9   : > { %1157 = vrot.lane.b32.xlu0 %v1156_v28, %s2718_s5 }
  0xfb   : > { %1987 = vmatmul.msk.bf16.vlgmr.msra.gmra.mxu3 %vm998_vm2, %v1013_v32 }
  0xfe   : > { %1440 = vrot.lane.b32.xlu2 %v1439_v34, %s3404_s20 }
 0x100   : > { %1445 = vrot.lane.b32.xlu1 %v1444_v36, %s3404_s20  ;;  %s1360_s20 = smul.f32 %s3104_s25, %s3104_s25 }
 0x101   : > { %1152 = vrot.lane.b32.xlu0 %v1151_v35, %s2718_s5 }
 0x109   : > { %988 = vperm.xlu0 %2204, %v3051_v37  }
 0x150   : > { %v1297_v43 = vpop.permute.xlu2 %1296 }
 0x158   : > { %v1441_v49 = vpop.permute.xlu2 %1440 }
 0x16a   : > { %v1302_v39 = vpop.permute.xlu1 %1301 }
 0x16b   : > { %v1158_v40 = vpop.permute.xlu0 %1157  ;;  %v1307_v42 = vsel %vm998_vm2, %v1302_v39, 0  ;;  %v1207_v39 = vstv %s3091_s1  ;;  %s2722_s1 = smov 8  }
 0x16c   : > { %v1163_v41 = vsel %vm998_vm2, %v1158_v40, 0  ;;  %1316 = vmatpush.bf16.xpose.msrb.mxu3 %v1307_v42  ;;  %v1351_v40 = vstv %s3093_s27  ;;  %s2723_s27 = smov 16  }
 0x16d   : > { %1172 = vmatpush.bf16.xpose.msrb.mxu1 %v1163_v41  ;;  %v1495_v41 = vstv %s3095_s29  ;;  %s2724_s29 = smov 24  }
 0x172   : > { %v1446_v44 = vpop.permute.xlu1 %1445 }
 0x173   : > { %v1153_v45 = vpop.permute.xlu0 %1152  ;;  %v1451_v46 = vsel %vm998_vm2, %v1446_v44, 0  ;;  %1993 = vmatmul.msk.bf16.vlgmr.msrb.gmra.mxu3 %vm998_vm2, %v1297_v43  ;;  %v1073_v43 = vstv %s3098_s24  ;;  %v1209_v44 = vstv %s3100_s30  ;;  %s3438_s24 = sld [smem:[#allocation54_spill]] }
 0x174   : > { %1989 = vmatmul.msk.bf16.vlgmr.msrb.gmra.mxu1 %vm998_vm2, %v1153_v45  ;;  %v1353_v45 = vstv %s3104_s25 }
 0x175   : > { %1460 = vmatpush.bf16.xpose.msra.mxu1 %v1451_v46  ;;  %v1497_v46 = vstv %s3106_s4 }
 0x17b   : > { %v989_v53 = vpop.permute.xlu0 %988 }
 0x17c   : > { %v992_v54 = vmul.f32 %v2208_v52, %v989_v53  ;;  %v991_v59 = vsub.f32 %v2208_v52, %v989_v53 }
 0x17e   : > { %v1030_v47 = vpop.f32.mrf.mxu3  ;;  %v993_v56 = vadd.f32 1e-08, %v992_v54 }
 0x17f   : > { %v1034_v48 = vmul.f32 0.35355338, %v1030_v47 }
 0x180   : > { %2218 = vrcp.f32 %v993_v56 }
 0x181   : > { %v1035_v50 = vsel %vm998_vm2, %v1034_v48, 0.0 }
 0x182   : > { %1036 = vadd.xlane.f32.xlu2 %v1035_v50 }
 0x184   : > { %1997 = vmatmul.msk.bf16.vlgmr.msra.gmra.mxu1 %vm998_vm2, %v1441_v49 }
 0x186   : > { %v1032_v51 = vpop.f32.mrf.mxu3  ;;  %v2219_v60 = vpop.eup %2218 }
 0x187   : > { %v995_v63 = vmul.f32 %v2219_v60, %v991_v59 }
 0x189   : > { %v3062_v3 = vmax.f32 %v995_v63, 0.0  ;;  %v3067_v11 = vmin.f32 %v995_v63, 0.0 }
 0x18b   : > { %v999_v10 = vsel %vm998_vm2, %v3062_v3, 0.0  ;;  %v1005_v14 = vmul.f32 %v3062_v3, %v3062_v3  ;;  %v1002_v17 = vsel %vm998_vm2, %v3067_v11, 0.0  ;;  %v1009_v23 = vmul.f32 %v3067_v11, %v3067_v11 }
 0x18d   : > { %v1006_v20 = vsel %vm998_vm2, %v1005_v14, 0.0  ;;  %v1010_v24 = vsel %vm998_vm2, %v1009_v23, 0.0 }
 0x1f1   : > { %v1174_v61 = vpop.f32.mrf.mxu1 }
 0x1f2   : > { %v1178_v0 = vmul.f32 0.35355338, %v1174_v61 }
 0x1f4   : > { %v1179_v1 = vsel %vm998_vm2, %v1178_v0, 0.0 }
 0x1f5   : > { %1180 = vadd.xlane.f32.xlu1 %v1179_v1  ;;  %v1037_v13 = vpop.xlane.xlu2 %1036  ;;  %v1358_v1 = vstv %s1357_s21 }
 0x1f6   : > { %v1318_v4 = vpop.f32.mrf.mxu3  ;;  %v1045_v16 = vmul.f32 %v3069_v12, %v1037_v13 }
 0x1f7   : > { %v1322_v6 = vmul.f32 0.35355338, %v1318_v4  ;;  %v1081_v4 = vstv %s1080_s22 }
 0x1f8   : > { %v3079_v21 = vsub.f32 %v1034_v48, %v1045_v16  ;;  %v1505_v16 = vstv %s1504_s6  ;;  %s869_s6 = sld [smem:[#allocation7]] }
 0x1f9   : > { %v1176_v8 = vpop.f32.mrf.mxu1  ;;  %v1323_v9 = vsel %vm998_vm2, %v1322_v6, 0.0 }
 0x1fa   : > { %1324 = vadd.xlane.f32.xlu2 %v1323_v9  ;;  %v1047_v25 = vmul.f32 %v3079_v21, %v3079_v21 }
 0x1fc   : > { %v1048_v27 = vsel %vm998_vm2, %v1047_v25, 0.0 }
 0x1fd   : > { %1000 = vadd.xlane.f32.xlu1 %v999_v10 }
 0x1fe   : > { %v1320_v15 = vpop.f32.mrf.mxu3 }
 0x1ff   : > { %v1361_v15 = vstv %s1360_s20  ;;  %s868_s20 = sld [smem:[#allocation6]] }
 0x201   : > { %v1462_v18 = vpop.f32.mrf.mxu1 }
 0x202   : > { %v3076_v19 = vmul.f32 0.35355338, %v1462_v18  ;;  %1003 = vadd.xlane.f32.xlu2 %v1002_v17 }
 0x204   : > { %v1467_v22 = vsel %vm998_vm2, %v3076_v19, 0.0 }
 0x205   : > { %1468 = vadd.xlane.f32.xlu0 %v1467_v22  ;;  %1007 = vadd.xlane.f32.xlu1 %v1006_v20 }
 0x209   : > { %v1464_v26 = vpop.f32.mrf.mxu1 }
 0x20a   : > { %1011 = vadd.xlane.f32.xlu2 %v1010_v24 }
 0x20d   : > { %1049 = vadd.xlane.f32.xlu1 %v1048_v27 }
 0x268   : > { %v1181_v28 = vpop.xlane.xlu1 %1180 }
 0x269   : > { %v1182_v29 = vmul.f32 %v1181_v28, %v3069_v12 }
 0x26b   : > { %v3102_v30 = vsub.f32 %v1178_v0, %v1182_v29 }
 0x26d   : > { %v1184_v31 = vmul.f32 %v3102_v30, %v3102_v30  ;;  %v1325_v32 = vpop.xlane.xlu2 %1324 }
 0x26e   : > { %v1326_v33 = vmul.f32 %v1325_v32, %v3069_v12 }
 0x26f   : > { %v1185_v34 = vsel %vm998_vm2, %v1184_v31, 0.0 }
 0x270   : > { %1186 = vadd.xlane.f32.xlu0 %v1185_v34  ;;  %v1001_v35 = vpop.xlane.xlu1 %1000  ;;  %v3112_v36 = vsub.f32 %v1322_v6, %v1326_v33  ;;  %v1217_v6 = vstv %s1216_s0 }
 0x271   : > { %v1072_v47 = vmul.f32 %v1071_v38, %v1001_v35  ;;  %v1208_v48 = vmul.f32 %v1207_v39, %v1001_v35  ;;  %v1352_v49 = vmul.f32 %v1351_v40, %v1001_v35  ;;  %v1496_v50 = vmul.f32 %v1495_v41, %v1001_v35 }
 0x272   : > { %v1328_v42 = vmul.f32 %v3112_v36, %v3112_v36 }
 0x274   : > { %v1329_v52 = vsel %vm998_vm2, %v1328_v42, 0.0 }
 0x275   : > { %v1004_v51 = vpop.xlane.xlu2 %1003 }
 0x276   : > { %v1074_v53 = vmul.f32 %v1073_v43, %v1004_v51  ;;  %v1210_v54 = vmul.f32 %v1209_v44, %v1004_v51  ;;  %v1354_v55 = vmul.f32 %v1353_v45, %v1004_v51  ;;  %v1498_v56 = vmul.f32 %v1497_v46, %v1004_v51 }
 0x278   : > { %v1008_v59 = vpop.xlane.xlu1 %1007  ;;  %1330 = vadd.xlane.f32.xlu0 %v1329_v52  ;;  %v1075_v60 = vadd.f32 %v1074_v53, %v1072_v47  ;;  %v1211_v61 = vadd.f32 %v1210_v54, %v1208_v48  ;;  %v1355_v62 = vadd.f32 %v1354_v55, %v1352_v49  ;;  %v1499_v63 = vadd.f32 %v1498_v56, %v1496_v50  ;;  %v1469_v0 = vpop.xlane.xlu0 %1468 }
 0x279   : > { %v1079_v13 = vmul.f32 %v1078_v57, %v1008_v59  ;;  %v1470_v14 = vmul.f32 %v1469_v0, %v3069_v12  ;;  %v1215_v23 = vmul.f32 %v1214_v58, %v1008_v59  ;;  %v1359_v24 = vmul.f32 %v1358_v1, %v1008_v59 }
 0x27a   : > { %v3157_v7 = vmul.f32 0.125, %v1075_v60  ;;  %v3159_v8 = vmul.f32 0.125, %v1211_v61  ;;  %v3161_v9 = vmul.f32 0.125, %v1355_v62  ;;  %v3163_v10 = vmul.f32 0.125, %v1499_v63 }
 0x27b   : > { %v1503_v25 = vmul.f32 %v1502_v2, %v1008_v59  ;;  %v3171_v26 = vsub.f32 %v3076_v19, %v1470_v14 }
 0x27c   : > { %v1084_v17 = vmul.f32 8.0, %v3157_v7  ;;  %v1220_v18 = vmul.f32 8.0, %v3159_v8  ;;  %v1364_v20 = vmul.f32 8.0, %v3161_v9  ;;  %v1508_v22 = vmul.f32 8.0, %v3163_v10 }
 0x27d   : > { %v1012_v27 = vpop.xlane.xlu2 %1011  ;;  %v1472_v48 = vmul.f32 %v3171_v26, %v3171_v26 }
 0x27e   : > { %v1085_v28 = vmul.f32 %v1084_v17, %v3157_v7  ;;  %v1221_v12 = vmul.f32 %v1220_v18, %v3159_v8  ;;  %v1365_v29 = vmul.f32 %v1364_v20, %v3161_v9  ;;  %v1509_v31 = vmul.f32 %v1508_v22, %v3163_v10 }
 0x27f   : > { %v1082_v32 = vmul.f32 %v1081_v4, %v1012_v27  ;;  %v1218_v33 = vmul.f32 %v1217_v6, %v1012_v27  ;;  %v1362_v34 = vmul.f32 %v1361_v15, %v1012_v27  ;;  %v1506_v35 = vmul.f32 %v1505_v16, %v1012_v27 }
 0x280   : > { %v1050_v42 = vpop.xlane.xlu1 %1049  ;;  %v1473_v52 = vsel %vm998_vm2, %v1472_v48, 0.0 }
 0x281   : > { %v1051_v47 = vmul.f32 0.14285715, %v1050_v42  ;;  %v1083_v19 = vadd.f32 %v1082_v32, %v1079_v13  ;;  %v1219_v49 = vadd.f32 %v1218_v33, %v1215_v23  ;;  %v1363_v50 = vadd.f32 %v1362_v34, %v1359_v24  ;;  %1474 = vadd.xlane.f32.xlu2 %v1473_v52 }
 0x282   : > { %v1507_v51 = vadd.f32 %v1506_v35, %v1503_v25 }
 0x283   : > { %2220 = vrsqrt.f32 %v1051_v47  ;;  %v1086_v53 = vsub.f32 %v1083_v19, %v1085_v28  ;;  %v1222_v54 = vsub.f32 %v1219_v49, %v1221_v12  ;;  %v1366_v55 = vsub.f32 %v1363_v50, %v1365_v29 }
 0x284   : > { %v1510_v56 = vsub.f32 %v1507_v51, %v1509_v31  ;;  %vm1059_vm4 = vcmp.eq.f32.partialorder %v1051_v47, inf  ;;  %v1062_v32 = vand.u32 2147483648, %v1051_v47  ;;  %vm1061_vm5 = vcmp.eq.f32.partialorder %v1051_v47, 0.0 }
 0x285   : > { %v1087_v57 = vmax.f32 %v1086_v53, 0.0  ;;  %v1223_v58 = vmax.f32 %v1222_v54, 0.0  ;;  %v1367_v59 = vmax.f32 %v1366_v55, 0.0 }
 0x286   : > { %v1511_v60 = vmax.f32 %v1510_v56, 0.0 }
 0x287   : > { %v3180_v61 = vmul.f32 0.14285715, %v1087_v57  ;;  %v3182_v62 = vmul.f32 0.14285715, %v1223_v58  ;;  %v3184_v63 = vmul.f32 0.14285715, %v1367_v59 }
 0x288   : > { %v3186_v1 = vmul.f32 0.14285715, %v1511_v60 }
 0x289   : > { %v2221_v0 = vpop.eup %2220  ;;  %2222 = vrsqrt.f32 %v3180_v61  ;;  %vm1096_vm6 = vcmp.eq.f32.partialorder %v3180_v61, inf  ;;  %vm1098_vm7 = vcmp.eq.f32.partialorder %v3180_v61, 0.0  ;;  %v1099_v51 = vand.u32 2147483648, %v3180_v61 }
 0x28a   : > { %v1053_v2 = vmul.f32 %v2221_v0, %v1051_v47  ;;  %2224 = vrsqrt.f32 %v3182_v62  ;;  %vm1232_vm8 = vcmp.eq.f32.partialorder %v3182_v62, inf  ;;  %vm1234_vm9 = vcmp.eq.f32.partialorder %v3182_v62, 0.0 }
 0x28b   : > { %2226 = vrsqrt.f32 %v3184_v63  ;;  %vm1376_vm10 = vcmp.eq.f32.partialorder %v3184_v63, inf  ;;  %vm1378_vm11 = vcmp.eq.f32.partialorder %v3184_v63, 0.0  ;;  %v1379_v59 = vand.u32 2147483648, %v3184_v63 }
 0x28c   : > { %v1054_v4 = vmul.f32 %v2221_v0, %v1053_v2  ;;  %2228 = vrsqrt.f32 %v3186_v1  ;;  %vm1520_vm12 = vcmp.eq.f32.partialorder %v3186_v1, inf  ;;  %vm1522_vm13 = vcmp.eq.f32.partialorder %v3186_v1, 0.0 }
 0x28e   : > { %v1055_v6 = vmul.f32 0.5, %v1054_v4  ;;  %v1523_v4 = vand.u32 2147483648, %v3186_v1 }
 0x28f   : > { %v2223_v13 = vpop.eup %2222 }
 0x290   : > { %v1056_v14 = vsub.f32 1.5, %v1055_v6  ;;  %v2225_v15 = vpop.eup %2224  ;;  %v1090_v16 = vmul.f32 %v2223_v13, %v3180_v61 }
 0x291   : > { %v2227_v17 = vpop.eup %2226  ;;  %v1226_v20 = vmul.f32 %v2225_v15, %v3182_v62 }
 0x292   : > { %v1057_v18 = vmul.f32 %v2221_v0, %v1056_v14  ;;  %v2229_v22 = vpop.eup %2228  ;;  %v1091_v23 = vmul.f32 %v2223_v13, %v1090_v16  ;;  %v1370_v24 = vmul.f32 %v2227_v17, %v3184_v63 }
 0x293   : > { %v1227_v27 = vmul.f32 %v2225_v15, %v1226_v20  ;;  %v1514_v28 = vmul.f32 %v2229_v22, %v3186_v1 }
 0x294   : > { %v1058_v25 = vmul.f32 %v1057_v18, %v1051_v47  ;;  %v1092_v12 = vmul.f32 0.5, %v1091_v23  ;;  %v1371_v29 = vmul.f32 %v2227_v17, %v1370_v24 }
 0x295   : > { %v1228_v33 = vmul.f32 0.5, %v1227_v27  ;;  %v1515_v34 = vmul.f32 %v2229_v22, %v1514_v28 }
 0x296   : > { %v1060_v31 = vsel %vm1059_vm4, %v1051_v47, %v1058_v25  ;;  %v1093_v35 = vsub.f32 1.5, %v1092_v12  ;;  %v1372_v42 = vmul.f32 0.5, %v1371_v29  ;;  %v1235_v47 = vand.u32 2147483648, %v3182_v62 }
 0x297   : > { %v1063_v48 = vsel %vm1061_vm5, %v1062_v32, %v1060_v31  ;;  %v1229_v19 = vsub.f32 1.5, %v1228_v33  ;;  %v1516_v49 = vmul.f32 0.5, %v1515_v34  ;;  %v1103_v25 = vstv %s869_s6 }
 0x298   : > { %v1094_v50 = vmul.f32 %v2223_v13, %v1093_v35  ;;  %v1373_v52 = vsub.f32 1.5, %v1372_v42  ;;  %v1064_v55 = vadd.f32 1e-05, %v1063_v48  ;;  %v3229_v31 = vstv %s868_s20 }
 0x299   : > { %v1230_v53 = vmul.f32 %v2225_v15, %v1229_v19  ;;  %v1517_v54 = vsub.f32 1.5, %v1516_v49 }
 0x29a   : > { %v1095_v56 = vmul.f32 %v1094_v50, %v3180_v61  ;;  %v1374_v57 = vmul.f32 %v2227_v17, %v1373_v52  ;;  %2230 = vrcp.f32 %v1064_v55 }
 0x29b   : > { %v1231_v58 = vmul.f32 %v1230_v53, %v3182_v62  ;;  %v1518_v60 = vmul.f32 %v2229_v22, %v1517_v54  ;;  %v2027_v54 = vld [vmem:[#allocation14] sm:$0xff] }
 0x29c   : > { %v1097_v0 = vsel %vm1096_vm6, %v3180_v61, %v1095_v56  ;;  %v1375_v2 = vmul.f32 %v1374_v57, %v3184_v63 }
 0x29d   : > { %v1100_v6 = vsel %vm1098_vm7, %v1099_v51, %v1097_v0  ;;  %v1233_v13 = vsel %vm1232_vm8, %v3182_v62, %v1231_v58  ;;  %v1519_v14 = vmul.f32 %v1518_v60, %v3186_v1  ;;  %vm1129_vm7 = vcmask 1043456  }
 0x29e   : > { %v1101_v15 = vadd.f32 1e-05, %v1100_v6  ;;  %v1236_v16 = vsel %vm1234_vm9, %v1235_v47, %v1233_v13  ;;  %v1377_v17 = vsel %vm1376_vm10, %v3184_v63, %v1375_v2  ;;  %vm1577_vm8 = vcmask 261312  }
 0x29f   : > { %v1237_v18 = vadd.f32 1e-05, %v1236_v16  ;;  %v1380_v61 = vsel %vm1378_vm11, %v1379_v59, %v1377_v17  ;;  %v1521_v20 = vsel %vm1520_vm12, %v3186_v1, %v1519_v14 }
 0x2a0   : > { %2232 = vrcp.f32 %v1101_v15  ;;  %v1381_v22 = vadd.f32 1e-05, %v1380_v61  ;;  %v1524_v23 = vsel %vm1522_vm13, %v1523_v4, %v1521_v20  ;;  %v2231_v62 = vpop.eup %2230 }
 0x2a1   : > { %2234 = vrcp.f32 %v1237_v18  ;;  %v1525_v24 = vadd.f32 1e-05, %v1524_v23  ;;  %v1066_v12 = vmul.f32 %v2231_v62, %v3079_v21 }
 0x2a2   : > { %2236 = vrcp.f32 %v1381_v22 }
 0x2a3   : > { %2238 = vrcp.f32 %v1525_v24  ;;  %v1068_v48 = vmul.f32 %v3229_v31, %v1066_v12 }
 0x2a6   : > { %v2233_v27 = vpop.eup %2232 }
 0x2a7   : > { %v2235_v28 = vpop.eup %2234  ;;  %v1104_v63 = vmul.f32 %v2233_v27, %v1103_v25 }
 0x2a8   : > { %v2237_v29 = vpop.eup %2236  ;;  %v3231_v1 = vmul.f32 %v2235_v28, %v1103_v25 }
 0x2a9   : > { %v2239_v32 = vpop.eup %2238  ;;  %v1105_v33 = vmul.f32 %v1104_v63, %v1071_v38  ;;  %v1108_v34 = vmul.f32 %v1104_v63, %v1073_v43  ;;  %v3237_v35 = vmul.f32 %v2237_v29, %v1103_v25  ;;  %v1111_v50 = vmul.f32 %v1104_v63, %v3157_v7  ;;  %v2028_v7 = vld [vmem:[#allocation14 + $0x8] sm:$0xff] }
 0x2aa   : > { %v3239_v42 = vmul.f32 %v2239_v32, %v1103_v25  ;;  %v3249_v38 = vmul.f32 %v3231_v1, %v3159_v8  ;;  %972 = vmatpush.bf16.msra.mxu2 %v2028_v7  ;;  %v1240_v28 = vmul.f32 %v3231_v1, %v1207_v39 }
 0x2ab   : > { %v1106_v19 = vmul.f32 %v1105_v33, %v3062_v3  ;;  %v1109_v49 = vmul.f32 %v1108_v34, %v3067_v11  ;;  %v3253_v43 = vmul.f32 %v3237_v35, %v3161_v9  ;;  %v1243_v34 = vmul.f32 %v3231_v1, %v1209_v44 }
 0x2ac   : > { %v3259_v47 = vmul.f32 %v3239_v42, %v3163_v10  ;;  %v1384_v7 = vmul.f32 %v3237_v35, %v1351_v40 }
 0x2ad   : > { %v1107_v21 = vadd.f32 %v1106_v19, %v1068_v48  ;;  %v1244_v39 = vmul.f32 %v1243_v34, %v3067_v11 }
 0x2ae   : > { %973 = vmatpush.bf16.msra.mxu2 %v2027_v54  ;;  %v1385_v40 = vmul.f32 %v1384_v7, %v3062_v3 }
 0x2af   : > { %v1110_v51 = vadd.f32 %v1109_v49, %v1107_v21  ;;  %v1241_v21 = vmul.f32 %v1240_v28, %v3062_v3 }
 0x2b1   : > { %v3245_v52 = vsub.f32 %v1110_v51, %v1111_v50  ;;  %1986 = vmatmul.msk.bf16.vlgmr.msra.gmra.mxu2 %vm891_vm0, %v3026_v5 }
 0x2b3   : > { %v1113_v53 = vsel %vm998_vm2, %v3245_v52, -inf }
 0x2b4   : > { %1114 = vmax.xlane.f32.xlu2 %v1113_v53 }
 0x2e3   : > { %v1187_v8 = vpop.xlane.xlu0 %1186 }
 0x2e4   : > { %v1188_v55 = vmul.f32 0.14285715, %v1187_v8 }
 0x2e6   : > { %2240 = vrsqrt.f32 %v1188_v55  ;;  %vm1196_vm14 = vcmp.eq.f32.partialorder %v1188_v55, inf  ;;  %v1199_v5 = vand.u32 2147483648, %v1188_v55  ;;  %vm1198_vm15 = vcmp.eq.f32.partialorder %v1188_v55, 0.0 }
 0x2eb   : > { %v1331_v9 = vpop.xlane.xlu0 %1330 }
 0x2ec   : > { %v2241_v56 = vpop.eup %2240  ;;  %v1332_v57 = vmul.f32 0.14285715, %v1331_v9 }
 0x2ed   : > { %v1190_v58 = vmul.f32 %v2241_v56, %v1188_v55 }
 0x2ee   : > { %2242 = vrsqrt.f32 %v1332_v57  ;;  %vm1340_vm3 = vcmp.eq.f32.partialorder %v1332_v57, inf  ;;  %v1343_v62 = vand.u32 2147483648, %v1332_v57  ;;  %vm1342_vm4 = vcmp.eq.f32.partialorder %v1332_v57, 0.0 }
 0x2ef   : > { %v1191_v59 = vmul.f32 %v2241_v56, %v1190_v58 }
 0x2f1   : > { %v1192_v60 = vmul.f32 0.5, %v1191_v59 }
 0x2f3   : > { %v1193_v10 = vsub.f32 1.5, %v1192_v60 }
 0x2f4   : > { %v2243_v0 = vpop.eup %2242  ;;  %v1475_v13 = vpop.xlane.xlu2 %1474 }
 0x2f5   : > { %v1334_v2 = vmul.f32 %v2243_v0, %v1332_v57  ;;  %v1194_v4 = vmul.f32 %v2241_v56, %v1193_v10  ;;  %v1476_v15 = vmul.f32 0.14285715, %v1475_v13  ;;  %v1528_v10 = vmul.f32 %v3239_v42, %v1495_v41 }
 0x2f7   : > { %v1335_v6 = vmul.f32 %v2243_v0, %v1334_v2  ;;  %v1195_v14 = vmul.f32 %v1194_v4, %v1188_v55  ;;  %2244 = vrsqrt.f32 %v1476_v15  ;;  %vm1484_vm5 = vcmp.eq.f32.partialorder %v1476_v15, inf }
 0x2f8   : > { %vm1486_vm6 = vcmp.eq.f32.partialorder %v1476_v15, 0.0  ;;  %v1531_v4 = vmul.f32 %v3239_v42, %v1497_v46  ;;  %v1529_v13 = vmul.f32 %v1528_v10, %v3062_v3 }
 0x2f9   : > { %v1336_v16 = vmul.f32 0.5, %v1335_v6  ;;  %v1197_v17 = vsel %vm1196_vm14, %v1188_v55, %v1195_v14  ;;  %v1487_v55 = vand.u32 2147483648, %v1476_v15 }
 0x2fa   : > { %v1200_v18 = vsel %vm1198_vm15, %v1199_v5, %v1197_v17 }
 0x2fb   : > { %v1337_v61 = vsub.f32 1.5, %v1336_v16  ;;  %v1201_v20 = vadd.f32 1e-05, %v1200_v18 }
 0x2fd   : > { %2246 = vrcp.f32 %v1201_v20  ;;  %v1338_v22 = vmul.f32 %v2243_v0, %v1337_v61  ;;  %v2245_v24 = vpop.eup %2244 }
 0x2fe   : > { %v1478_v25 = vmul.f32 %v2245_v24, %v1476_v15 }
 0x2ff   : > { %v1339_v23 = vmul.f32 %v1338_v22, %v1332_v57 }
 0x300   : > { %v1479_v29 = vmul.f32 %v2245_v24, %v1478_v25 }
 0x301   : > { %v1341_v27 = vsel %vm1340_vm3, %v1332_v57, %v1339_v23 }
 0x302   : > { %v1344_v12 = vsel %vm1342_vm4, %v1343_v62, %v1341_v27  ;;  %v1480_v48 = vmul.f32 0.5, %v1479_v29 }
 0x303   : > { %v2247_v63 = vpop.eup %2246  ;;  %v1345_v32 = vadd.f32 1e-05, %v1344_v12 }
 0x304   : > { %v1203_v33 = vmul.f32 %v2247_v63, %v3102_v30  ;;  %v1481_v49 = vsub.f32 1.5, %v1480_v48  ;;  %v1387_v30 = vmul.f32 %v3237_v35, %v1353_v45 }
 0x305   : > { %2248 = vrcp.f32 %v1345_v32 }
 0x306   : > { %v1204_v19 = vmul.f32 %v1203_v33, %v3229_v31  ;;  %v1482_v51 = vmul.f32 %v2245_v24, %v1481_v49 }
 0x308   : > { %v1242_v50 = vadd.f32 %v1241_v21, %v1204_v19  ;;  %v1483_v44 = vmul.f32 %v1482_v51, %v1476_v15 }
 0x30a   : > { %v1245_v53 = vadd.f32 %v1244_v39, %v1242_v50  ;;  %v1485_v9 = vsel %vm1484_vm5, %v1476_v15, %v1483_v44  ;;  %v1532_v15 = vmul.f32 %v1531_v4, %v3067_v11 }
 0x30b   : > { %v2249_v54 = vpop.eup %2248  ;;  %v1488_v58 = vsel %vm1486_vm6, %v1487_v55, %v1485_v9 }
 0x30c   : > { %v1247_v1 = vsub.f32 %v1245_v53, %v3249_v38  ;;  %v1347_v8 = vmul.f32 %v2249_v54, %v3112_v36  ;;  %v1489_v45 = vadd.f32 1e-05, %v1488_v58  ;;  %v1388_v38 = vmul.f32 %v1387_v30, %v3067_v11 }
 0x30e   : > { %v1248_v56 = vsel %vm998_vm2, %v1247_v1, -inf  ;;  %v1348_v57 = vmul.f32 %v1347_v8, %v3229_v31  ;;  %2250 = vrcp.f32 %v1489_v45 }
 0x30f   : > { %1249 = vmax.xlane.f32.xlu1 %v1248_v56 }
 0x310   : > { %v1386_v35 = vadd.f32 %v1385_v40, %v1348_v57 }
 0x312   : > { %v1389_v36 = vadd.f32 %v1388_v38, %v1386_v35 }
 0x314   : > { %v1391_v59 = vsub.f32 %v1389_v36, %v3253_v43  ;;  %v2251_v0 = vpop.eup %2250 }
 0x315   : > { %v1491_v2 = vmul.f32 %v2251_v0, %v3171_v26 }
 0x316   : > { %v1392_v60 = vsel %vm998_vm2, %v1391_v59, -inf }
 0x317   : > { %1393 = vmax.xlane.f32.xlu1 %v1392_v60  ;;  %v1492_v6 = vmul.f32 %v1491_v2, %v3229_v31  ;;  %v2209_v31 = vld [vmem:[#allocation20] ss:$0 sm:$0xff] }
 0x319   : > { %v1530_v14 = vadd.f32 %v1529_v13, %v1492_v6 }
 0x31b   : > { %v1533_v43 = vadd.f32 %v1532_v15, %v1530_v14 }
 0x31d   : > { %v1535_v5 = vsub.f32 %v1533_v43, %v3259_v47 }
 0x31f   : > { %v1536_v16 = vsel %vm998_vm2, %v1535_v5, -inf }
 0x320   : > { %1537 = vmax.xlane.f32.xlu0 %v1536_v16 }
 0x327   : > { %v1115_v41 = vpop.xlane.xlu2 %1114 }
 0x328   : > { %v1116_v17 = vsub.f32 %v3245_v52, %v1115_v41 }
 0x32a   : > { %v1117_v26 = vmul.f32 1.442695, %v1116_v17 }
 0x32c   : > { %2252 = vpow2.f32 %v1117_v26  ;;  %v2030_v26 = vld [vmem:[#allocation15 + $0x8] sm:$0xff] }
 0x32d   : > { %1610 = vmatpush.bf16.msra.mxu3 %v2030_v26 }
 0x332   : > { %v2253_v18 = vpop.eup %2252 }
 0x333   : > { %v1119_v46 = vsel %vm998_vm2, %v2253_v18, 0.0 }
 0x334   : > { %1120 = vadd.xlane.f32.xlu0 %v1119_v46  ;;  %v975_v3 = vpop.f32.mrf.mxu2 }
 0x335   : > { %v976_v42 = vadd.f32 %v2209_v31, %v975_v3  ;;  %v2211_v31 = vld [vmem:[#allocation27] ss:$0 sm:$0xff]  ;;  %v2029_v3 = vld [vmem:[#allocation15] sm:$0xff] }
 0x336   : > { %1611 = vmatpush.bf16.msra.mxu3 %v2029_v3 }
 0x337   : > { %v979_v61 = vpack.c.bf16 %v976_v42, %v976_v42 }
 0x339   : > { %980 = vst.msk [vmem:[#allocation4] sm:$0xf] %vm909_vm1, %v979_v61  ;;  %v2032_v61 = vld [vmem:[%s3388_s17 + $0x8] sm:$0xff]  ;;  %vm1289_vm1 = vcmask 130112  }
 0x33c   : > { %v977_v11 = vpop.f32.mrf.mxu2 }
 0x340   : > { %v1260_v47 = vld [vmem:[#allocation4] sm:$0xf] }
 0x341   : > { %v1125_v20 = vld [vmem:[#allocation4] sm:$0xf]  ;;  %v1262_v22 = vunpack.c.l.b16 %v1260_v47 }
 0x342   : > { %v1131_v23 = vsel %vm1129_vm7, %v1125_v20, 0  ;;  %v1404_v50 = vld [vmem:[#allocation4] sm:$0xf]  ;;  %v2031_v20 = vld [vmem:[%s3388_s17] sm:$0xff] }
 0x343   : > { %1140 = vmatpush.bf16.msrb.mxu0 %v1131_v23  ;;  %v1263_v52 = vpack.c.b16 %v1262_v22, %v1262_v22  ;;  %v1406_v39 = vunpack.c.l.b16 %v1404_v50  ;;  %v1548_v44 = vld [vmem:[#allocation4] sm:$0xf]  ;;  %v2725_v50 = vmov 32.0  }
 0x345   : > { %1264 = vrot.lane.b32.xlu1 %v1263_v52, %s2718_s5  ;;  %v1407_v53 = vpack.c.b16 %v1406_v39, %v1406_v39  ;;  %s3434_s5 = smov 112  }
 0x382   : > { %v1250_v24 = vpop.xlane.xlu1 %1249 }
 0x383   : > { %v1251_v62 = vsub.f32 %v1247_v1, %v1250_v24  ;;  %v1550_v1 = vunpack.c.l.b16 %v1548_v44 }
 0x385   : > { %v1252_v25 = vmul.f32 1.442695, %v1251_v62  ;;  %v1551_v8 = vpack.c.b16 %v1550_v1, %v1550_v1 }
 0x387   : > { %2254 = vpow2.f32 %v1252_v25 }
 0x38a   : > { %v1394_v27 = vpop.xlane.xlu1 %1393 }
 0x38b   : > { %v1395_v28 = vsub.f32 %v1391_v59, %v1394_v27 }
 0x38d   : > { %v2255_v12 = vpop.eup %2254  ;;  %v1396_v63 = vmul.f32 1.442695, %v1395_v28 }
 0x38e   : > { %v1254_v29 = vsel %vm998_vm2, %v2255_v12, 0.0 }
 0x38f   : > { %2256 = vpow2.f32 %v1396_v63  ;;  %1255 = vadd.xlane.f32.xlu2 %v1254_v29  ;;  %v2213_v63 = vld [vmem:[%s3389_s18] ss:$0 sm:$0xff] }
 0x393   : > { %v1538_v33 = vpop.xlane.xlu0 %1537 }
 0x394   : > { %v1539_v48 = vsub.f32 %v1535_v5, %v1538_v33 }
 0x395   : > { %v2257_v32 = vpop.eup %2256 }
 0x396   : > { %v1398_v34 = vsel %vm998_vm2, %v2257_v32, 0.0  ;;  %v1540_v19 = vmul.f32 1.442695, %v1539_v48 }
 0x397   : > { %1399 = vadd.xlane.f32.xlu0 %v1398_v34  ;;  %v2272_v34 = vld [vmem:[%s3023_s3] sm:$0xff]  ;;  %s852_s3 = sand.u32 1, %s2693_s28  }
 0x398   : > { %2258 = vpow2.f32 %v1540_v19  ;;  %s1957_s21 = sshll.u32 %s852_s3, 3  ;;  %s1714_s4 = scalar_lea.sflag [#allocation10], %s852_s3 }
 0x399   : > { %s854_s30 = scalar_lea.vmem [#allocation29], %s1957_s21 }
 0x39a   : > { %s1726_s14 = sshll.u32 %s854_s30, 4  ;;  %s1727_s14 = int_to_ptr.vmem [resolvable:$true] %s1726_s14 }
 0x39e   : > { %v2259_v21 = vpop.eup %2258 }
 0x39f   : > { %v1542_v49 = vsel %vm998_vm2, %v2259_v21, 0.0 }
 0x3a0   : > { %1543 = vadd.xlane.f32.xlu2 %v1542_v49 }
 0x3a7   : > { %v1121_v51 = vpop.xlane.xlu0 %1120 }
 0x3a8   : > { %2260 = vrcp.f32 %v1121_v51 }
 0x3ab   : > { %1408 = vrot.lane.b32.xlu0 %v1407_v53, %s3434_s5  ;;  %s3436_s5 = sld [smem:[#allocation55_spill]] }
 0x3ae   : > { %v2261_v7 = vpop.eup %2260 }
 0x3af   : > { %v1123_v54 = vmul.f32 %v2261_v7, %v2253_v18  ;;  %v2210_v18 = vld [vmem:[#allocation26] ss:$0 sm:$0xff] }
 0x3b1   : > { %v1124_v30 = vpack.c.bf16 %v1123_v54, %v1123_v54  ;;  %s2623_s21 = scalar_lea.hbm %s3436_s5, 16 }
 0x3b3   : > { %1988 = vmatmul.msk.bf16.vlgmr.msrb.gmra.mxu0 %vm998_vm2, %v1124_v30 }
 0x3b7   : > { %v1265_v55 = vpop.permute.xlu1 %1264 }
 0x3b8   : > { %1552 = vrot.lane.b32.xlu2 %v1551_v8, %s3435_s23  ;;  %v1270_v9 = vsel %vm1129_vm7, %v1265_v55, 0  ;;  %s1724_s23 = scalar_lea.hbm %s3436_s5, %s2020_s2 }
 0x3b9   : > { %1279 = vmatpush.bf16.msrb.mxu2 %v1270_v9  ;;  %s1728_s25 = sshll.u32 %s1724_s23, 4  ;;  %s1729_s25 = int_to_ptr.hbm [resolvable:$true] %s1728_s25 }
 0x3ba   : > { %s2617_s26 = sshra.s32 %s1729_s25, 4  ;;  %s2618_s26 = int_to_ptr.hbm [resolvable:$true] %s2617_s26 }
 0x3bb   : > { %s2619_s13 = scalar_lea.hbm %s2618_s26, 8  ;;  %p2624_p3 = scmp.lt.s32.totalorder %s2618_s26, %s3436_s5 }
 0x3bc   : > { %p2620_p0 = scmp.ne.s32.totalorder %s2618_s26, %s2619_s13  ;;  %p2625_p4 = scmp.lt.s32.totalorder %s2623_s21, %s2619_s13 }
 0x3be   : > { %p2621_p1 = pnand %p2620_p0, %p2880_p5  ;;  %p2626_p7 = por %p2625_p4, %p2624_p3 }
 0x3c0   : > { %1622 = vperm.xlu2 %2205, %v3051_v37   ;;  %p2622_p2 = pneg %p2621_p1 }
 0x3c2   : > { %p2627_p8 = pnand %p2626_p7, %p2622_p2 }
 0x402   : > { %v1256_v56 = vpop.xlane.xlu2 %1255 }
 0x403   : > { %2262 = vrcp.f32 %v1256_v56 }
 0x409   : > { %v2263_v57 = vpop.eup %2262 }
 0x40a   : > { %v1258_v40 = vmul.f32 %v2263_v57, %v2255_v12  ;;  %v1400_v45 = vpop.xlane.xlu0 %1399  ;;  %v2212_v12 = vld [vmem:[#allocation21] ss:$0 sm:$0xff] }
 0x40b   : > { %2264 = vrcp.f32 %v1400_v45 }
 0x40c   : > { %v1259_v58 = vpack.c.bf16 %v1258_v40, %v1258_v40 }
 0x40e   : > { %1992 = vmatmul.msk.bf16.vlgmr.msrb.gmra.mxu2 %vm998_vm2, %v1259_v58 }
 0x411   : > { %v2265_v38 = vpop.eup %2264 }
 0x412   : > { %v1402_v36 = vmul.f32 %v2265_v38, %v2257_v32 }
 0x413   : > { %v1544_v35 = vpop.xlane.xlu2 %1543 }
 0x414   : > { %2266 = vrcp.f32 %v1544_v35  ;;  %v1403_v4 = vpack.c.bf16 %v1402_v36, %v1402_v36 }
 0x415   : > { %2268 = vrcp.f32 %v2725_v50 }
 0x41a   : > { %v2267_v59 = vpop.eup %2266 }
 0x41b   : > { %v1546_v37 = vmul.f32 %v2267_v59, %v2259_v21  ;;  %v1553_v10 = vpop.permute.xlu2 %1552  ;;  %v2269_v39 = vpop.eup %2268 }
 0x41c   : > { %v1558_v2 = vsel %vm1129_vm7, %v1553_v10, 0  ;;  %v1677_v51 = vmul.f32 32.0, %v2269_v39  ;;  %vm1681_vm9 = vweird.f32 %v2269_v39 }
 0x41d   : > { %v1409_v60 = vpop.permute.xlu0 %1408  ;;  %v1547_v6 = vpack.c.bf16 %v1546_v37, %v1546_v37  ;;  %1567 = vmatpush.bf16.msra.mxu2 %v1558_v2 }
 0x41e   : > { %v1414_v0 = vsel %vm1129_vm7, %v1409_v60, 0  ;;  %v1678_v53 = vsub.f32 1.0, %v1677_v51  ;;  %v2214_v60 = vld [vmem:[%s3390_s19] ss:$0 sm:$0xff] }
 0x41f   : > { %1423 = vmatpush.bf16.msra.mxu0 %v1414_v0  ;;  %v2215_v0 = vld [vmem:[%s3438_s24] ss:$0 sm:$0xff] }
 0x420   : > { %2000 = vmatmul.msk.bf16.vlgmr.msra.gmra.mxu2 %vm998_vm2, %v1547_v6  ;;  %v1679_v7 = vmul.f32 %v2269_v39, %v1678_v53 }
 0x422   : > { %1996 = vmatmul.msk.bf16.vlgmr.msra.gmra.mxu0 %vm998_vm2, %v1403_v4  ;;  %v1680_v54 = vadd.f32 %v2269_v39, %v1679_v7 }
 0x423   : > { %v1623_v46 = vpop.permute.xlu2 %1622  ;;  %1665 = vmatpush.bf16.msrb.mxu0 %v2032_v61 }
 0x424   : > { %v1628_v42 = vmul.f32 %v2210_v18, %v1623_v46  ;;  %v1682_v30 = vsel %vm1681_vm9, %v2269_v39, %v1680_v54 }
 0x426   : > { %v1633_v11 = vadd.f32 %v2211_v31, %v1628_v42 }
 0x427   : > { %1666 = vmatpush.bf16.msrb.mxu0 %v2031_v20 }
 0x428   : > { %v1634_v47 = vmax.f32 %v1633_v11, 0.0 }
 0x42a   : > { %v1635_v22 = vpack.c.bf16 %v1634_v47, %v1634_v47 }
 0x430   : > { %v1142_v13 = vpop.f32.mrf.mxu0 }
 0x431   : > { %1146 = vst.msk [vmem:[#allocation5] sm:$0xff] %vm998_vm2, %v1142_v13  ;;  %vm1433_vm2 = vcmask 195712  }
 0x432   : > { %2018 = vmatmul.msk.bf16.vlgmr.msrb.gmra.mxu0 %vm891_vm0, %v1635_v22 }
 0x438   : > { %v1144_v14 = vpop.f32.mrf.mxu0 }
 0x491   : > { %v1281_v15 = vpop.f32.mrf.mxu2 }
 0x492   : > { %1286 = vrot.lane.b32.xlu1 %v1281_v15, %s2722_s1 }
 0x499   : > { %v1283_v43 = vpop.f32.mrf.mxu2 }
 0x49f   : > { %v1425_v5 = vpop.f32.mrf.mxu0 }
 0x4a0   : > { %1430 = vrot.lane.b32.xlu1 %v1425_v5, %s2723_s27 }
 0x4a3   : > { %v1569_v16 = vpop.f32.mrf.mxu2 }
 0x4a4   : > { %1574 = vrot.lane.b32.xlu0 %v1569_v16, %s2724_s29 }
 0x4a7   : > { %v1427_v41 = vpop.f32.mrf.mxu0 }
 0x4ab   : > { %v1571_v17 = vpop.f32.mrf.mxu2 }
 0x4af   : > { %v1668_v27 = vpop.f32.mrf.mxu0 }
 0x4b0   : > { %v1669_v33 = vadd.f32 %v2213_v63, %v1668_v27 }
 0x4b7   : > { %v1670_v28 = vpop.f32.mrf.mxu0 }
 0x504   : > { %v1287_v23 = vpop.permute.xlu1 %1286 }
 0x505   : > { %1290 = vst.msk [vmem:[#allocation5] sm:$0xff] %vm1289_vm1, %v1287_v23 }
 0x512   : > { %v1431_v52 = vpop.permute.xlu1 %1430 }
 0x513   : > { %1434 = vst.msk [vmem:[#allocation5] sm:$0xff] %vm1433_vm2, %v1431_v52 }
 0x516   : > { %v1575_v24 = vpop.permute.xlu0 %1574 }
 0x517   : > { %1578 = vst.msk [vmem:[#allocation5] sm:$0xff] %vm1577_vm8, %v1575_v24 }
 0x51e   : > { %v1579_v62 = vld [vmem:[#allocation5] sm:$0xff] }
 0x51f   : > { %v1580_v25 = vpack.c.bf16 %v1579_v62, %v1579_v62 }
 0x521   : > { %2009 = vmatmul.msk.bf16.vlgmr.msra.gmra.mxu3 %vm891_vm0, %v1580_v25 }
 0x5a4   : > { %v1613_v29 = vpop.f32.mrf.mxu3 }
 0x5a5   : > { %v1614_v32 = vadd.f32 %v2212_v12, %v1613_v29 }
 0x5a7   : > { %v1617_v48 = vadd.f32 %v2272_v34, %v1614_v32 }
 0x5a9   : > { %v1672_v19 = vadd.f32 %v1669_v33, %v1617_v48 }
 0x5ab   : > { %v1673_v21 = vsel %vm891_vm0, %v1672_v19, 0.0 }
 0x5ac   : > { %v1615_v49 = vpop.f32.mrf.mxu3  ;;  %1674 = vadd.xlane.f32.xlu1 %v1673_v21 }
 0x61f   : > { %v1675_v44 = vpop.xlane.xlu1 %1674 }
 0x620   : > { %v1683_v1 = vmul.f32 %v1682_v30, %v1675_v44 }
 0x622   : > { %v1684_v8 = vsub.f32 %v1672_v19, %v1683_v1 }
 0x624   : > { %v1685_v55 = vmul.f32 %v1684_v8, %v1684_v8 }
 0x626   : > { %v1686_v9 = vsel %vm891_vm0, %v1685_v55, 0.0 }
 0x627   : > { %1687 = vadd.xlane.f32.xlu0 %v1686_v9 }
 0x69a   : > { %v1688_v56 = vpop.xlane.xlu0 %1687 }
 0x69b   : > { %v1689_v57 = vmul.f32 %v1688_v56, %v1682_v30 }
 0x69d   : > { %v1690_v40 = vadd.f32 1e-05, %v1689_v57 }
 0x69f   : > { %2270 = vrsqrt.f32 %v1690_v40  ;;  %vm1697_vm11 = vweird.f32 %v1690_v40 }
 0x6a5   : > { %v2271_v58 = vpop.eup %2270 }
 0x6a6   : > { %v1692_v45 = vmul.f32 %v2271_v58, %v1690_v40  ;;  %vm1698_vm10 = vweird.f32 %v2271_v58 }
 0x6a7   : > { %vm1699_vm12 = vmor %vm1697_vm11, %vm1698_vm10 }
 0x6a8   : > { %v1693_v35 = vmul.f32 %v2271_v58, %v1692_v45 }
 0x6aa   : > { %v1694_v38 = vmul.f32 0.5, %v1693_v35 }
 0x6ac   : > { %v1695_v36 = vsub.f32 1.5, %v1694_v38 }
 0x6ae   : > { %v1696_v59 = vmul.f32 %v2271_v58, %v1695_v36 }
 0x6b0   : > { %v1700_v37 = vsel %vm1699_vm12, %v2271_v58, %v1696_v59 }
 0x6b1   : > { %v1701_v10 = vmul.f32 %v1700_v37, %v1684_v8 }
 0x6b3   : > { %v1706_v2 = vmul.f32 %v2214_v60, %v1701_v10 }
 0x6b5   : > { %v1711_v4 = vadd.f32 %v2215_v0, %v1706_v2 }
 0x6b7   : > { %1712 = vst.msk [vmem:[%s854_s30] sm:$0xff] %vm891_vm0, %v1711_v4 }
 0x6b8   : > { %2630 = shalt.err (!%p2627_p8)
}
 0x6b9   : > { %2081 = dma.vmem_to_hbm [thread:$0]  (%p2880_p5), %s1727_s14, 128, %s1729_s25, %s1714_s4  }
 0x6ba PF: > { %s3439_s3 = sld [smem:[#allocation42_spill]] }
 0x6bb   : > { %s3440_s20 = sld [smem:[#allocation40_spill]] }
 0x6c0   : > { %p2148_p9 = scmp.ge.s32.totalorder %s3439_s3, 2 }
 0x6c1   : > { %s1740_s27 = sand.u32 1, %s3440_s20  }
 0x6c2   : > { %p2121_p10 = pnand %p2148_p9, %p2884_p6  ;;  %s1741_s29 = scalar_lea.sflag [#allocation10], %s1740_s27 }
 0x6c4   : > { %p2122_p11 = pneg %p2121_p10 }
 0x6c6   : > { %2684 = dma.done.wait (%p2122_p11), %s1741_s29, 128  }
 0x6c7   : > { %2686 = vsyncadd (%p2122_p11), %s1741_s29, 4294967168  ;;  %s3442_s13 = sld [smem:[#allocation43_spill]]  ;;  %s3445_s3 = smov %s2693_s28 }
 0x6c8   : > { %s3443_s24 = sld [smem:[#allocation41_spill]] }
 0x6c9   : > { %s3444_s29 = sld [smem:[#allocation44_spill]] }
 0x6cd   : > { %p41_p12 = scmp.ge.s32.totalorder %s3442_s13, 4  }
 0x6ce   : > { %s3446_s28 = smov %s3443_s24 }
 0x6cf   :  { %43 = sbr.rel (!%p41_p12) target bundleno = 23 (0x17), region = 195 }
 0x6d4   :  { %1747 = vsyncpa [#allocation9], 1 }
 0x6d5   :  { %1749 = vsyncpa [#allocation9 + $0x1], 1 }
 0x6d6   :  { %1750 = vsyncpa [#allocation13], 1 }
 0x6d7   :  { %1751 = vsyncpa [#allocation16], 1 }
 0x6d8   :  { %1752 = vsyncpa [#allocation19], 1 }
 0x6d9   :  { %1753 = vsyncpa [#allocation22], 1 }
 0x6da   :  { %1754 = vsyncpa [#allocation28], 1 }
 0x6db   :  { %1755 = vsyncpa [#allocation10], 1 }
 0x6dc   :  { %1757 = vsyncpa [#allocation10 + $0x1], 1 }
 0x6dd   :  { %1758 = vsyncpa [#allocation11], 1 }
 0x6de   :  { %1760 = vsyncpa [#allocation11 + $0x1], 1 }
 0x6df   :  { %1761 = vsyncpa [#allocation25], 1 }

</bundles_post_ra>
